<compile_context>
chip_gen: v6e
topology: v6e:2x2x1
jax: 0.10.0
libtpu: 0.0.40
codegen_flags: <defaults>
</compile_context>

<pallas_src>
import functools

import jax
import jax.numpy as jnp
from jax import lax
from jax.experimental import pallas as pl
from jax.experimental.pallas import tpu as pltpu

NEG_SLOPE = 0.01   # nn.LeakyReLU default negative_slope
BN_EPS = 1e-5      # nn.BatchNorm1d default eps
MAXPAD = 5         # largest conv padding in the block (conv2: k=11, pad=5)


def _leaky(v):
    return jnp.where(v > 0, v, NEG_SLOPE * v)


def se_bottleneck_kernel(x_ref, w1_ref, s1_ref, b1_ref,
                         w2_ref, s2_ref, b2_ref,
                         w3_ref, s3_ref, b3_ref,
                         wf1_ref, wf2_ref, o_ref,
                         slab_ref, p1_ref, p2_ref, p3_ref,
                         *, n_batch, seq_len):
    BL = n_batch * seq_len
    x = x_ref[...]                                        # (BL, Cin) f32

    # Hoisted once per grid step: sequence position of every flat row.
    l_idx = lax.broadcasted_iota(jnp.int32, (BL, 1), 0) % seq_len
    slab_ref[...] = jnp.zeros_like(slab_ref)              # zero the pad rows once

    def conv(inp, w_ref, pad, patch_ref):
        """im2col conv1d (stride 1): builds (BL, K*Cin) patches via static
        slices of a zero-padded VMEM slab, then a single MXU matmul."""
        cin = inp.shape[1]
        k_taps = 2 * pad + 1
        slab_ref[MAXPAD:MAXPAD + BL, :cin] = inp
        for k in range(k_taps):
            d = k - pad
            shifted = slab_ref[MAXPAD + d:MAXPAD + d + BL, :cin]
            # zero rows whose source position l+d falls outside [0, L)
            # (also kills cross-batch leakage in the flat layout)
            valid = jnp.logical_and(l_idx + d >= 0, l_idx + d < seq_len)
            patch_ref[:, k * cin:(k + 1) * cin] = jnp.where(valid, shifted, 0.0)
        return jnp.dot(patch_ref[...], w_ref[...],
                       preferred_element_type=jnp.float32)

    out = conv(x, w1_ref, 3, p1_ref)                      # conv1, k=7
    out = _leaky(out * s1_ref[...] + b1_ref[...])         # bn1 (folded) + LeakyReLU
    # TODO(synk): nn.Dropout(0.2) implemented with eval semantics (identity);
    # training-mode dropout would need pltpu.prng_seed / prng_random_bits.
    out = conv(out, w2_ref, 5, p2_ref)                    # conv2, k=11, stride=1
    out = _leaky(out * s2_ref[...] + b2_ref[...])         # bn2 + LeakyReLU
    out = conv(out, w3_ref, 3, p3_ref)                    # conv3, k=7
    out = out * s3_ref[...] + b3_ref[...]                 # bn3 (no relu before SE)

    # SELayer + residual + final LeakyReLU, per batch element (static unroll).
    wf1 = wf1_ref[...]                                    # (1, C)
    wf2 = wf2_ref[...]                                    # (1, C)
    for b in range(n_batch):
        lo, hi = b * seq_len, (b + 1) * seq_len
        seg = out[lo:hi, :]
        pooled = jnp.mean(seg, axis=0, keepdims=True)     # AdaptiveAvgPool1d(1)
        # SE MLP (hidden dim == 1): VPU multiply + XLU lane-reduction instead
        # of two near-empty MXU passes.
        h = _leaky(jnp.sum(pooled * wf1, axis=1, keepdims=True))   # (1, 1)
        gate = jax.nn.sigmoid(h * wf2)                    # (1, C)
        o_ref[lo:hi, :] = _leaky(seg * gate + x[lo:hi, :])  # gate + residual + relu


def _pick_batch_tile(batch, seq_len, target_rows=256):
    """Batch elements per grid step: fill the MXU M-dim, keep B % TB == 0."""
    tb = max(1, min(batch, target_rows // max(seq_len, 1)))
    while batch % tb:
        tb -= 1
    return tb


def se_bottleneck_pallas(x_ncl, params):
    B, Cin, L = x_ncl.shape
    C = params["w3"].shape[0]
    planes = params["w1"].shape[0]
    assert C == Cin, "downsample=None requires inplanes == expansion*planes"
    assert params["fc1"].shape[0] == 1, "SE hidden dim != 1 not supported"
    # TODO(synk): SE hidden dims > 1 would need a jnp.dot fallback in-kernel.

    # channels-last, flattened over (batch, length): (B*L, Cin)
    x_flat = jnp.transpose(x_ncl, (0, 2, 1)).reshape(B * L, Cin).astype(jnp.float32)

    def fold_bn(bn):
        scale = (bn["gamma"] / jnp.sqrt(bn["var"] + BN_EPS)).astype(jnp.float32)
        shift = (bn["beta"] - bn["mean"] * scale).astype(jnp.float32)
        return scale[None, :], shift[None, :]

    def prep_conv(w):
        # PyTorch Conv1d weight (Cout, Cin, K) -> im2col layout (K*Cin, Cout)
        cout, cin, k = w.shape
        return jnp.transpose(w, (2, 1, 0)).reshape(k * cin, cout).astype(jnp.float32)

    w1 = prep_conv(params["w1"])
    w2 = prep_conv(params["w2"])
    w3 = prep_conv(params["w3"])
    s1, b1 = fold_bn(params["bn1"])
    s2, b2 = fold_bn(params["bn2"])
    s3, b3 = fold_bn(params["bn3"])
    wf1 = params["fc1"].astype(jnp.float32)               # (1, C)  Linear(C, 1)
    wf2 = jnp.transpose(params["fc2"]).astype(jnp.float32)  # (1, C)  Linear(1, C)

    TB = _pick_batch_tile(B, L)
    rows = TB * L
    cmax = max(Cin, planes)

    def full(shape):
        return pl.BlockSpec(shape, lambda i, _n=len(shape): (0,) * _n)

    kernel = functools.partial(se_bottleneck_kernel, n_batch=TB, seq_len=L)

    out_flat = pl.pallas_call(
        kernel,
        out_shape=jax.ShapeDtypeStruct((B * L, C), jnp.float32),
        grid=(B // TB,),
        in_specs=[
            pl.BlockSpec((rows, Cin), lambda i: (i, 0)),
            full(w1.shape), full(s1.shape), full(b1.shape),
            full(w2.shape), full(s2.shape), full(b2.shape),
            full(w3.shape), full(s3.shape), full(b3.shape),
            full(wf1.shape), full(wf2.shape),
        ],
        out_specs=pl.BlockSpec((rows, C), lambda i: (i, 0)),
        scratch_shapes=[
            pltpu.VMEM((2 * MAXPAD + rows, cmax), jnp.float32),  # padded shift slab
            pltpu.VMEM((rows, w1.shape[0]), jnp.float32),        # im2col patches conv1
            pltpu.VMEM((rows, w2.shape[0]), jnp.float32),        # im2col patches conv2
            pltpu.VMEM((rows, w3.shape[0]), jnp.float32),        # im2col patches conv3
        ],
        compiler_params=pltpu.CompilerParams(
            dimension_semantics=("parallel",)),
    )(x_flat, w1, s1, b1, w2, s2, b2, w3, s3, b3, wf1, wf2)

    return jnp.transpose(out_flat.reshape(B, L, C), (0, 2, 1))


def se_bottleneck_ref(x, p):
    """Pure-JAX reference in the PyTorch NCL layout (eval-mode semantics)."""
    def conv(v, w, pad):
        return lax.conv_general_dilated(v, w, (1,), [(pad, pad)],
                                        dimension_numbers=("NCH", "OIH", "NCH"))

    def bn(v, b):
        return ((v - b["mean"][None, :, None])
                / jnp.sqrt(b["var"][None, :, None] + BN_EPS)
                * b["gamma"][None, :, None] + b["beta"][None, :, None])

    out = _leaky(bn(conv(x, p["w1"], 3), p["bn1"]))
    out = _leaky(bn(conv(out, p["w2"], 5), p["bn2"]))
    out = bn(conv(out, p["w3"], 3), p["bn3"])
    y = jnp.mean(out, axis=2)                             # (B, C)
    y = _leaky(y @ p["fc1"].T)
    y = jax.nn.sigmoid(y @ p["fc2"].T)
    out = out * y[:, :, None]
    return _leaky(out + x)


if __name__ == "__main__":
    # inplanes must equal expansion*planes since downsample is None.
    inplanes, planes, L, B = 16, 4, 16, 2
    c = 4 * planes                                        # SE channel = 16, reduction = 16

    key = jax.random.PRNGKey(0)
    k = jax.random.split(key, 6)
    params = {
        "w1": 0.1 * jax.random.normal(k[0], (planes, inplanes, 7), jnp.float32),
        "w2": 0.1 * jax.random.normal(k[1], (planes, planes, 11), jnp.float32),
        "w3": 0.1 * jax.random.normal(k[2], (c, planes, 7), jnp.float32),
        "fc1": 0.1 * jax.random.normal(k[3], (c // 16, c), jnp.float32),
        "fc2": 0.1 * jax.random.normal(k[4], (c, c // 16), jnp.float32),
        "bn1": dict(gamma=jnp.ones(planes), beta=jnp.zeros(planes),
                    mean=jnp.zeros(planes), var=jnp.ones(planes)),
        "bn2": dict(gamma=jnp.ones(planes), beta=jnp.zeros(planes),
                    mean=jnp.zeros(planes), var=jnp.ones(planes)),
        "bn3": dict(gamma=jnp.ones(c), beta=jnp.zeros(c),
                    mean=jnp.zeros(c), var=jnp.ones(c)),
    }
    x = jax.random.normal(k[5], (B, inplanes, L), jnp.float32)

    out = jax.block_until_ready(se_bottleneck_pallas(x, params))
    ref = se_bottleneck_ref(x, params)

    assert out.shape == (B, c, L), out.shape
    max_err = float(jnp.max(jnp.abs(out - ref)))
    assert jnp.allclose(out, ref, atol=1e-4, rtol=1e-4), max_err
    print("KERNEL_OK")
</pallas_src>

<mosaic_0001>
module attributes {stable_mosaic.version = 11 : i64} {
  func.func @se_bottleneck_kernel(%arg0: i32, %arg1: memref<32x16xf32, #tpu.memory_space<vmem>>, %arg2: memref<112x4xf32, #tpu.memory_space<vmem>>, %arg3: memref<1x4xf32, #tpu.memory_space<vmem>>, %arg4: memref<1x4xf32, #tpu.memory_space<vmem>>, %arg5: memref<44x4xf32, #tpu.memory_space<vmem>>, %arg6: memref<1x4xf32, #tpu.memory_space<vmem>>, %arg7: memref<1x4xf32, #tpu.memory_space<vmem>>, %arg8: memref<28x16xf32, #tpu.memory_space<vmem>>, %arg9: memref<1x16xf32, #tpu.memory_space<vmem>>, %arg10: memref<1x16xf32, #tpu.memory_space<vmem>>, %arg11: memref<1x16xf32, #tpu.memory_space<vmem>>, %arg12: memref<1x16xf32, #tpu.memory_space<vmem>>, %arg13: memref<32x16xf32, #tpu.memory_space<vmem>>, %arg14: memref<42x16xf32, #tpu.memory_space<vmem>>, %arg15: memref<32x112xf32, #tpu.memory_space<vmem>>, %arg16: memref<32x44xf32, #tpu.memory_space<vmem>>, %arg17: memref<32x28xf32, #tpu.memory_space<vmem>>) attributes {dimension_semantics = [#tpu.dimension_semantics<parallel>], iteration_bounds = array<i64: 1>, scalar_prefetch = 0 : i64, scratch_operands = 4 : i64, tpu.core_type = #tpu.core_type<tc>, window_params = [{transform_indices = @transform_0, window_bounds = array<i64: 32, 16>}, {pipeline_mode = #tpu.pipeline_mode<synchronous>, transform_indices = @transform_1, window_bounds = array<i64: 112, 4>}, {pipeline_mode = #tpu.pipeline_mode<synchronous>, transform_indices = @transform_2, window_bounds = array<i64: 1, 4>}, {pipeline_mode = #tpu.pipeline_mode<synchronous>, transform_indices = @transform_3, window_bounds = array<i64: 1, 4>}, {pipeline_mode = #tpu.pipeline_mode<synchronous>, transform_indices = @transform_4, window_bounds = array<i64: 44, 4>}, {pipeline_mode = #tpu.pipeline_mode<synchronous>, transform_indices = @transform_5, window_bounds = array<i64: 1, 4>}, {pipeline_mode = #tpu.pipeline_mode<synchronous>, transform_indices = @transform_6, window_bounds = array<i64: 1, 4>}, {pipeline_mode = #tpu.pipeline_mode<synchronous>, transform_indices = @transform_7, window_bounds = array<i64: 28, 16>}, {pipeline_mode = #tpu.pipeline_mode<synchronous>, transform_indices = @transform_8, window_bounds = array<i64: 1, 16>}, {pipeline_mode = #tpu.pipeline_mode<synchronous>, transform_indices = @transform_9, window_bounds = array<i64: 1, 16>}, {pipeline_mode = #tpu.pipeline_mode<synchronous>, transform_indices = @transform_10, window_bounds = array<i64: 1, 16>}, {pipeline_mode = #tpu.pipeline_mode<synchronous>, transform_indices = @transform_11, window_bounds = array<i64: 1, 16>}, {transform_indices = @transform_12, window_bounds = array<i64: 32, 16>}]} {
    %c0 = arith.constant 0 : index
    %c0_0 = arith.constant 0 : index
    %0 = vector.load %arg1[%c0, %c0_0] : memref<32x16xf32, #tpu.memory_space<vmem>>, vector<32x16xf32>
    %1 = tpu.iota {dimensions = array<i32: 0>} : vector<32x1xi32>
    %c16_i32 = arith.constant 16 : i32
    %c0_i32 = arith.constant 0 : i32
    %2 = arith.cmpi eq, %c16_i32, %c0_i32 : i32
    %c1_i32 = arith.constant 1 : i32
    %3 = arith.select %2, %c1_i32, %c16_i32 : i32
    %4 = vector.broadcast %3 : i32 to vector<32x1xi32>
    %5 = arith.remsi %1, %4 : vector<32x1xi32>
    %c0_i32_1 = arith.constant 0 : i32
    %6 = vector.broadcast %c0_i32_1 : i32 to vector<32x1xi32>
    %7 = arith.cmpi ne, %5, %6 : vector<32x1xi32>
    %c0_i32_2 = arith.constant 0 : i32
    %8 = vector.broadcast %c0_i32_2 : i32 to vector<32x1xi32>
    %9 = arith.cmpi slt, %5, %8 : vector<32x1xi32>
    %c0_i32_3 = arith.constant 0 : i32
    %10 = arith.cmpi slt, %3, %c0_i32_3 : i32
    %11 = vector.broadcast %10 : i1 to vector<32x1xi1>
    %12 = vector.broadcast %11 : vector<32x1xi1> to vector<32x1xi1>
    %13 = arith.xori %9, %12 : vector<32x1xi1>
    %14 = arith.andi %13, %7 : vector<32x1xi1>
    %15 = vector.broadcast %3 : i32 to vector<32x1xi32>
    %16 = arith.addi %5, %15 : vector<32x1xi32>
    %17 = arith.select %14, %16, %5 : vector<32x1xi1>, vector<32x1xi32>
    %cst = arith.constant 0.000000e+00 : f32
    %18 = vector.broadcast %cst : f32 to vector<42x16xf32>
    %c0_4 = arith.constant 0 : index
    %c0_5 = arith.constant 0 : index
    %19 = vector.load %arg14[%c0_4, %c0_5] : memref<42x16xf32, #tpu.memory_space<vmem>>, vector<42x16xf32>
    tpu.vector_store %arg14[%c0_4, %c0_5], %18 {strides = array<i32>} : memref<42x16xf32, #tpu.memory_space<vmem>>, vector<42x16xf32>,
    %c5 = arith.constant 5 : index
    %c0_6 = arith.constant 0 : index
    %20 = vector.load %arg14[%c5, %c0_6] : memref<42x16xf32, #tpu.memory_space<vmem>>, vector<32x16xf32>
    tpu.vector_store %arg14[%c5, %c0_6], %0 {strides = array<i32>} : memref<42x16xf32, #tpu.memory_space<vmem>>, vector<32x16xf32>,
    %c2 = arith.constant 2 : index
    %c0_7 = arith.constant 0 : index
    %21 = vector.load %arg14[%c2, %c0_7] : memref<42x16xf32, #tpu.memory_space<vmem>>, vector<32x16xf32>
    %c-3_i32 = arith.constant -3 : i32
    %22 = vector.broadcast %c-3_i32 : i32 to vector<32x1xi32>
    %23 = arith.addi %17, %22 : vector<32x1xi32>
    %c0_i32_8 = arith.constant 0 : i32
    %24 = vector.broadcast %c0_i32_8 : i32 to vector<32x1xi32>
    %25 = arith.cmpi sge, %23, %24 : vector<32x1xi32>
    %c-3_i32_9 = arith.constant -3 : i32
    %26 = vector.broadcast %c-3_i32_9 : i32 to vector<32x1xi32>
    %27 = arith.addi %17, %26 : vector<32x1xi32>
    %c16_i32_10 = arith.constant 16 : i32
    %28 = vector.broadcast %c16_i32_10 : i32 to vector<32x1xi32>
    %29 = arith.cmpi slt, %27, %28 : vector<32x1xi32>
    %30 = arith.andi %25, %29 : vector<32x1xi1>
    %cst_11 = arith.constant 0.000000e+00 : f32
    %31 = vector.shape_cast %30 : vector<32x1xi1> to vector<32x1xi1>
    %32 = vector.broadcast %31 : vector<32x1xi1> to vector<32x16xi1>
    %33 = vector.broadcast %cst_11 : f32 to vector<32x16xf32>
    %34 = arith.select %32, %21, %33 : vector<32x16xi1>, vector<32x16xf32>
    %c0_12 = arith.constant 0 : index
    %c0_13 = arith.constant 0 : index
    %35 = vector.load %arg15[%c0_12, %c0_13] : memref<32x112xf32, #tpu.memory_space<vmem>>, vector<32x16xf32>
    tpu.vector_store %arg15[%c0_12, %c0_13], %34 {strides = array<i32>} : memref<32x112xf32, #tpu.memory_space<vmem>>, vector<32x16xf32>,
    %c3 = arith.constant 3 : index
    %c0_14 = arith.constant 0 : index
    %36 = vector.load %arg14[%c3, %c0_14] : memref<42x16xf32, #tpu.memory_space<vmem>>, vector<32x16xf32>
    %c-2_i32 = arith.constant -2 : i32
    %37 = vector.broadcast %c-2_i32 : i32 to vector<32x1xi32>
    %38 = arith.addi %17, %37 : vector<32x1xi32>
    %c0_i32_15 = arith.constant 0 : i32
    %39 = vector.broadcast %c0_i32_15 : i32 to vector<32x1xi32>
    %40 = arith.cmpi sge, %38, %39 : vector<32x1xi32>
    %c-2_i32_16 = arith.constant -2 : i32
    %41 = vector.broadcast %c-2_i32_16 : i32 to vector<32x1xi32>
    %42 = arith.addi %17, %41 : vector<32x1xi32>
    %c16_i32_17 = arith.constant 16 : i32
    %43 = vector.broadcast %c16_i32_17 : i32 to vector<32x1xi32>
    %44 = arith.cmpi slt, %42, %43 : vector<32x1xi32>
    %45 = arith.andi %40, %44 : vector<32x1xi1>
    %cst_18 = arith.constant 0.000000e+00 : f32
    %46 = vector.shape_cast %45 : vector<32x1xi1> to vector<32x1xi1>
    %47 = vector.broadcast %46 : vector<32x1xi1> to vector<32x16xi1>
    %48 = vector.broadcast %cst_18 : f32 to vector<32x16xf32>
    %49 = arith.select %47, %36, %48 : vector<32x16xi1>, vector<32x16xf32>
    %c0_19 = arith.constant 0 : index
    %c16 = arith.constant 16 : index
    %50 = vector.load %arg15[%c0_19, %c16] : memref<32x112xf32, #tpu.memory_space<vmem>>, vector<32x16xf32>
    tpu.vector_store %arg15[%c0_19, %c16], %49 {strides = array<i32>} : memref<32x112xf32, #tpu.memory_space<vmem>>, vector<32x16xf32>,
    %c4 = arith.constant 4 : index
    %c0_20 = arith.constant 0 : index
    %51 = vector.load %arg14[%c4, %c0_20] : memref<42x16xf32, #tpu.memory_space<vmem>>, vector<32x16xf32>
    %c-1_i32 = arith.constant -1 : i32
    %52 = vector.broadcast %c-1_i32 : i32 to vector<32x1xi32>
    %53 = arith.addi %17, %52 : vector<32x1xi32>
    %c0_i32_21 = arith.constant 0 : i32
    %54 = vector.broadcast %c0_i32_21 : i32 to vector<32x1xi32>
    %55 = arith.cmpi sge, %53, %54 : vector<32x1xi32>
    %c-1_i32_22 = arith.constant -1 : i32
    %56 = vector.broadcast %c-1_i32_22 : i32 to vector<32x1xi32>
    %57 = arith.addi %17, %56 : vector<32x1xi32>
    %c16_i32_23 = arith.constant 16 : i32
    %58 = vector.broadcast %c16_i32_23 : i32 to vector<32x1xi32>
    %59 = arith.cmpi slt, %57, %58 : vector<32x1xi32>
    %60 = arith.andi %55, %59 : vector<32x1xi1>
    %cst_24 = arith.constant 0.000000e+00 : f32
    %61 = vector.shape_cast %60 : vector<32x1xi1> to vector<32x1xi1>
    %62 = vector.broadcast %61 : vector<32x1xi1> to vector<32x16xi1>
    %63 = vector.broadcast %cst_24 : f32 to vector<32x16xf32>
    %64 = arith.select %62, %51, %63 : vector<32x16xi1>, vector<32x16xf32>
    %c0_25 = arith.constant 0 : index
    %c32 = arith.constant 32 : index
    %65 = vector.load %arg15[%c0_25, %c32] : memref<32x112xf32, #tpu.memory_space<vmem>>, vector<32x16xf32>
    tpu.vector_store %arg15[%c0_25, %c32], %64 {strides = array<i32>} : memref<32x112xf32, #tpu.memory_space<vmem>>, vector<32x16xf32>,
    %c5_26 = arith.constant 5 : index
    %c0_27 = arith.constant 0 : index
    %66 = vector.load %arg14[%c5_26, %c0_27] : memref<42x16xf32, #tpu.memory_space<vmem>>, vector<32x16xf32>
    %c0_i32_28 = arith.constant 0 : i32
    %67 = vector.broadcast %c0_i32_28 : i32 to vector<32x1xi32>
    %68 = arith.addi %17, %67 : vector<32x1xi32>
    %c0_i32_29 = arith.constant 0 : i32
    %69 = vector.broadcast %c0_i32_29 : i32 to vector<32x1xi32>
    %70 = arith.cmpi sge, %68, %69 : vector<32x1xi32>
    %c0_i32_30 = arith.constant 0 : i32
    %71 = vector.broadcast %c0_i32_30 : i32 to vector<32x1xi32>
    %72 = arith.addi %17, %71 : vector<32x1xi32>
    %c16_i32_31 = arith.constant 16 : i32
    %73 = vector.broadcast %c16_i32_31 : i32 to vector<32x1xi32>
    %74 = arith.cmpi slt, %72, %73 : vector<32x1xi32>
    %75 = arith.andi %70, %74 : vector<32x1xi1>
    %cst_32 = arith.constant 0.000000e+00 : f32
    %76 = vector.shape_cast %75 : vector<32x1xi1> to vector<32x1xi1>
    %77 = vector.broadcast %76 : vector<32x1xi1> to vector<32x16xi1>
    %78 = vector.broadcast %cst_32 : f32 to vector<32x16xf32>
    %79 = arith.select %77, %66, %78 : vector<32x16xi1>, vector<32x16xf32>
    %c0_33 = arith.constant 0 : index
    %c48 = arith.constant 48 : index
    %80 = vector.load %arg15[%c0_33, %c48] : memref<32x112xf32, #tpu.memory_space<vmem>>, vector<32x16xf32>
    tpu.vector_store %arg15[%c0_33, %c48], %79 {strides = array<i32>} : memref<32x112xf32, #tpu.memory_space<vmem>>, vector<32x16xf32>,
    %c6 = arith.constant 6 : index
    %c0_34 = arith.constant 0 : index
    %81 = vector.load %arg14[%c6, %c0_34] : memref<42x16xf32, #tpu.memory_space<vmem>>, vector<32x16xf32>
    %c1_i32_35 = arith.constant 1 : i32
    %82 = vector.broadcast %c1_i32_35 : i32 to vector<32x1xi32>
    %83 = arith.addi %17, %82 : vector<32x1xi32>
    %c0_i32_36 = arith.constant 0 : i32
    %84 = vector.broadcast %c0_i32_36 : i32 to vector<32x1xi32>
    %85 = arith.cmpi sge, %83, %84 : vector<32x1xi32>
    %c1_i32_37 = arith.constant 1 : i32
    %86 = vector.broadcast %c1_i32_37 : i32 to vector<32x1xi32>
    %87 = arith.addi %17, %86 : vector<32x1xi32>
    %c16_i32_38 = arith.constant 16 : i32
    %88 = vector.broadcast %c16_i32_38 : i32 to vector<32x1xi32>
    %89 = arith.cmpi slt, %87, %88 : vector<32x1xi32>
    %90 = arith.andi %85, %89 : vector<32x1xi1>
    %cst_39 = arith.constant 0.000000e+00 : f32
    %91 = vector.shape_cast %90 : vector<32x1xi1> to vector<32x1xi1>
    %92 = vector.broadcast %91 : vector<32x1xi1> to vector<32x16xi1>
    %93 = vector.broadcast %cst_39 : f32 to vector<32x16xf32>
    %94 = arith.select %92, %81, %93 : vector<32x16xi1>, vector<32x16xf32>
    %c0_40 = arith.constant 0 : index
    %c64 = arith.constant 64 : index
    %95 = vector.load %arg15[%c0_40, %c64] : memref<32x112xf32, #tpu.memory_space<vmem>>, vector<32x16xf32>
    tpu.vector_store %arg15[%c0_40, %c64], %94 {strides = array<i32>} : memref<32x112xf32, #tpu.memory_space<vmem>>, vector<32x16xf32>,
    %c7 = arith.constant 7 : index
    %c0_41 = arith.constant 0 : index
    %96 = vector.load %arg14[%c7, %c0_41] : memref<42x16xf32, #tpu.memory_space<vmem>>, vector<32x16xf32>
    %c2_i32 = arith.constant 2 : i32
    %97 = vector.broadcast %c2_i32 : i32 to vector<32x1xi32>
    %98 = arith.addi %17, %97 : vector<32x1xi32>
    %c0_i32_42 = arith.constant 0 : i32
    %99 = vector.broadcast %c0_i32_42 : i32 to vector<32x1xi32>
    %100 = arith.cmpi sge, %98, %99 : vector<32x1xi32>
    %c2_i32_43 = arith.constant 2 : i32
    %101 = vector.broadcast %c2_i32_43 : i32 to vector<32x1xi32>
    %102 = arith.addi %17, %101 : vector<32x1xi32>
    %c16_i32_44 = arith.constant 16 : i32
    %103 = vector.broadcast %c16_i32_44 : i32 to vector<32x1xi32>
    %104 = arith.cmpi slt, %102, %103 : vector<32x1xi32>
    %105 = arith.andi %100, %104 : vector<32x1xi1>
    %cst_45 = arith.constant 0.000000e+00 : f32
    %106 = vector.shape_cast %105 : vector<32x1xi1> to vector<32x1xi1>
    %107 = vector.broadcast %106 : vector<32x1xi1> to vector<32x16xi1>
    %108 = vector.broadcast %cst_45 : f32 to vector<32x16xf32>
    %109 = arith.select %107, %96, %108 : vector<32x16xi1>, vector<32x16xf32>
    %c0_46 = arith.constant 0 : index
    %c80 = arith.constant 80 : index
    %110 = vector.load %arg15[%c0_46, %c80] : memref<32x112xf32, #tpu.memory_space<vmem>>, vector<32x16xf32>
    tpu.vector_store %arg15[%c0_46, %c80], %109 {strides = array<i32>} : memref<32x112xf32, #tpu.memory_space<vmem>>, vector<32x16xf32>,
    %c8 = arith.constant 8 : index
    %c0_47 = arith.constant 0 : index
    %111 = vector.load %arg14[%c8, %c0_47] : memref<42x16xf32, #tpu.memory_space<vmem>>, vector<32x16xf32>
    %c3_i32 = arith.constant 3 : i32
    %112 = vector.broadcast %c3_i32 : i32 to vector<32x1xi32>
    %113 = arith.addi %17, %112 : vector<32x1xi32>
    %c0_i32_48 = arith.constant 0 : i32
    %114 = vector.broadcast %c0_i32_48 : i32 to vector<32x1xi32>
    %115 = arith.cmpi sge, %113, %114 : vector<32x1xi32>
    %c3_i32_49 = arith.constant 3 : i32
    %116 = vector.broadcast %c3_i32_49 : i32 to vector<32x1xi32>
    %117 = arith.addi %17, %116 : vector<32x1xi32>
    %c16_i32_50 = arith.constant 16 : i32
    %118 = vector.broadcast %c16_i32_50 : i32 to vector<32x1xi32>
    %119 = arith.cmpi slt, %117, %118 : vector<32x1xi32>
    %120 = arith.andi %115, %119 : vector<32x1xi1>
    %cst_51 = arith.constant 0.000000e+00 : f32
    %121 = vector.shape_cast %120 : vector<32x1xi1> to vector<32x1xi1>
    %122 = vector.broadcast %121 : vector<32x1xi1> to vector<32x16xi1>
    %123 = vector.broadcast %cst_51 : f32 to vector<32x16xf32>
    %124 = arith.select %122, %111, %123 : vector<32x16xi1>, vector<32x16xf32>
    %c0_52 = arith.constant 0 : index
    %c96 = arith.constant 96 : index
    %125 = vector.load %arg15[%c0_52, %c96] : memref<32x112xf32, #tpu.memory_space<vmem>>, vector<32x16xf32>
    tpu.vector_store %arg15[%c0_52, %c96], %124 {strides = array<i32>} : memref<32x112xf32, #tpu.memory_space<vmem>>, vector<32x16xf32>,
    %c0_53 = arith.constant 0 : index
    %c0_54 = arith.constant 0 : index
    %126 = vector.load %arg15[%c0_53, %c0_54] : memref<32x112xf32, #tpu.memory_space<vmem>>, vector<32x112xf32>
    %c0_55 = arith.constant 0 : index
    %c0_56 = arith.constant 0 : index
    %127 = vector.load %arg2[%c0_55, %c0_56] : memref<112x4xf32, #tpu.memory_space<vmem>>, vector<112x4xf32>
    %cst_57 = arith.constant dense<0.000000e+00> : vector<32x4xf32>
    %128 = tpu.matmul %126, %127, %cst_57 {dimension_numbers = #tpu.dot_dimension_numbers<[1], [0], [0], [1], [0, 0, 1, 1], [], []>} : vector<32x112xf32>, vector<112x4xf32>, vector<32x4xf32> -> vector<32x4xf32>
    %c0_58 = arith.constant 0 : index
    %c0_59 = arith.constant 0 : index
    %129 = vector.load %arg3[%c0_58, %c0_59] : memref<1x4xf32, #tpu.memory_space<vmem>>, vector<1x4xf32>
    %130 = vector.broadcast %129 : vector<1x4xf32> to vector<32x4xf32>
    %131 = arith.mulf %128, %130 : vector<32x4xf32>
    %c0_60 = arith.constant 0 : index
    %c0_61 = arith.constant 0 : index
    %132 = vector.load %arg4[%c0_60, %c0_61] : memref<1x4xf32, #tpu.memory_space<vmem>>, vector<1x4xf32>
    %133 = vector.broadcast %132 : vector<1x4xf32> to vector<32x4xf32>
    %134 = arith.addf %131, %133 : vector<32x4xf32>
    %cst_62 = arith.constant 0.000000e+00 : f32
    %135 = vector.broadcast %cst_62 : f32 to vector<32x4xf32>
    %136 = arith.cmpf ogt, %134, %135 : vector<32x4xf32>
    %cst_63 = arith.constant 0.00999999977 : f32
    %137 = vector.broadcast %cst_63 : f32 to vector<32x4xf32>
    %138 = arith.mulf %137, %134 : vector<32x4xf32>
    %139 = arith.select %136, %134, %138 : vector<32x4xi1>, vector<32x4xf32>
    %c5_64 = arith.constant 5 : index
    %c0_65 = arith.constant 0 : index
    %140 = vector.load %arg14[%c5_64, %c0_65] : memref<42x16xf32, #tpu.memory_space<vmem>>, vector<32x4xf32>
    tpu.vector_store %arg14[%c5_64, %c0_65], %139 {strides = array<i32>} : memref<42x16xf32, #tpu.memory_space<vmem>>, vector<32x4xf32>,
    %c0_66 = arith.constant 0 : index
    %c0_67 = arith.constant 0 : index
    %141 = vector.load %arg14[%c0_66, %c0_67] : memref<42x16xf32, #tpu.memory_space<vmem>>, vector<32x4xf32>
    %c-5_i32 = arith.constant -5 : i32
    %142 = vector.broadcast %c-5_i32 : i32 to vector<32x1xi32>
    %143 = arith.addi %17, %142 : vector<32x1xi32>
    %c0_i32_68 = arith.constant 0 : i32
    %144 = vector.broadcast %c0_i32_68 : i32 to vector<32x1xi32>
    %145 = arith.cmpi sge, %143, %144 : vector<32x1xi32>
    %c-5_i32_69 = arith.constant -5 : i32
    %146 = vector.broadcast %c-5_i32_69 : i32 to vector<32x1xi32>
    %147 = arith.addi %17, %146 : vector<32x1xi32>
    %c16_i32_70 = arith.constant 16 : i32
    %148 = vector.broadcast %c16_i32_70 : i32 to vector<32x1xi32>
    %149 = arith.cmpi slt, %147, %148 : vector<32x1xi32>
    %150 = arith.andi %145, %149 : vector<32x1xi1>
    %cst_71 = arith.constant 0.000000e+00 : f32
    %151 = vector.shape_cast %150 : vector<32x1xi1> to vector<32x1xi1>
    %152 = vector.broadcast %151 : vector<32x1xi1> to vector<32x4xi1>
    %153 = vector.broadcast %cst_71 : f32 to vector<32x4xf32>
    %154 = arith.select %152, %141, %153 : vector<32x4xi1>, vector<32x4xf32>
    %c0_72 = arith.constant 0 : index
    %c0_73 = arith.constant 0 : index
    %155 = vector.load %arg16[%c0_72, %c0_73] : memref<32x44xf32, #tpu.memory_space<vmem>>, vector<32x4xf32>
    tpu.vector_store %arg16[%c0_72, %c0_73], %154 {strides = array<i32>} : memref<32x44xf32, #tpu.memory_space<vmem>>, vector<32x4xf32>,
    %c1 = arith.constant 1 : index
    %c0_74 = arith.constant 0 : index
    %156 = vector.load %arg14[%c1, %c0_74] : memref<42x16xf32, #tpu.memory_space<vmem>>, vector<32x4xf32>
    %c-4_i32 = arith.constant -4 : i32
    %157 = vector.broadcast %c-4_i32 : i32 to vector<32x1xi32>
    %158 = arith.addi %17, %157 : vector<32x1xi32>
    %c0_i32_75 = arith.constant 0 : i32
    %159 = vector.broadcast %c0_i32_75 : i32 to vector<32x1xi32>
    %160 = arith.cmpi sge, %158, %159 : vector<32x1xi32>
    %c-4_i32_76 = arith.constant -4 : i32
    %161 = vector.broadcast %c-4_i32_76 : i32 to vector<32x1xi32>
    %162 = arith.addi %17, %161 : vector<32x1xi32>
    %c16_i32_77 = arith.constant 16 : i32
    %163 = vector.broadcast %c16_i32_77 : i32 to vector<32x1xi32>
    %164 = arith.cmpi slt, %162, %163 : vector<32x1xi32>
    %165 = arith.andi %160, %164 : vector<32x1xi1>
    %cst_78 = arith.constant 0.000000e+00 : f32
    %166 = vector.shape_cast %165 : vector<32x1xi1> to vector<32x1xi1>
    %167 = vector.broadcast %166 : vector<32x1xi1> to vector<32x4xi1>
    %168 = vector.broadcast %cst_78 : f32 to vector<32x4xf32>
    %169 = arith.select %167, %156, %168 : vector<32x4xi1>, vector<32x4xf32>
    %c0_79 = arith.constant 0 : index
    %c4_80 = arith.constant 4 : index
    %170 = vector.load %arg16[%c0_79, %c4_80] : memref<32x44xf32, #tpu.memory_space<vmem>>, vector<32x4xf32>
    tpu.vector_store %arg16[%c0_79, %c4_80], %169 {strides = array<i32>} : memref<32x44xf32, #tpu.memory_space<vmem>>, vector<32x4xf32>,
    %c2_81 = arith.constant 2 : index
    %c0_82 = arith.constant 0 : index
    %171 = vector.load %arg14[%c2_81, %c0_82] : memref<42x16xf32, #tpu.memory_space<vmem>>, vector<32x4xf32>
    %c-3_i32_83 = arith.constant -3 : i32
    %172 = vector.broadcast %c-3_i32_83 : i32 to vector<32x1xi32>
    %173 = arith.addi %17, %172 : vector<32x1xi32>
    %c0_i32_84 = arith.constant 0 : i32
    %174 = vector.broadcast %c0_i32_84 : i32 to vector<32x1xi32>
    %175 = arith.cmpi sge, %173, %174 : vector<32x1xi32>
    %c-3_i32_85 = arith.constant -3 : i32
    %176 = vector.broadcast %c-3_i32_85 : i32 to vector<32x1xi32>
    %177 = arith.addi %17, %176 : vector<32x1xi32>
    %c16_i32_86 = arith.constant 16 : i32
    %178 = vector.broadcast %c16_i32_86 : i32 to vector<32x1xi32>
    %179 = arith.cmpi slt, %177, %178 : vector<32x1xi32>
    %180 = arith.andi %175, %179 : vector<32x1xi1>
    %cst_87 = arith.constant 0.000000e+00 : f32
    %181 = vector.shape_cast %180 : vector<32x1xi1> to vector<32x1xi1>
    %182 = vector.broadcast %181 : vector<32x1xi1> to vector<32x4xi1>
    %183 = vector.broadcast %cst_87 : f32 to vector<32x4xf32>
    %184 = arith.select %182, %171, %183 : vector<32x4xi1>, vector<32x4xf32>
    %c0_88 = arith.constant 0 : index
    %c8_89 = arith.constant 8 : index
    %185 = vector.load %arg16[%c0_88, %c8_89] : memref<32x44xf32, #tpu.memory_space<vmem>>, vector<32x4xf32>
    tpu.vector_store %arg16[%c0_88, %c8_89], %184 {strides = array<i32>} : memref<32x44xf32, #tpu.memory_space<vmem>>, vector<32x4xf32>,
    %c3_90 = arith.constant 3 : index
    %c0_91 = arith.constant 0 : index
    %186 = vector.load %arg14[%c3_90, %c0_91] : memref<42x16xf32, #tpu.memory_space<vmem>>, vector<32x4xf32>
    %c-2_i32_92 = arith.constant -2 : i32
    %187 = vector.broadcast %c-2_i32_92 : i32 to vector<32x1xi32>
    %188 = arith.addi %17, %187 : vector<32x1xi32>
    %c0_i32_93 = arith.constant 0 : i32
    %189 = vector.broadcast %c0_i32_93 : i32 to vector<32x1xi32>
    %190 = arith.cmpi sge, %188, %189 : vector<32x1xi32>
    %c-2_i32_94 = arith.constant -2 : i32
    %191 = vector.broadcast %c-2_i32_94 : i32 to vector<32x1xi32>
    %192 = arith.addi %17, %191 : vector<32x1xi32>
    %c16_i32_95 = arith.constant 16 : i32
    %193 = vector.broadcast %c16_i32_95 : i32 to vector<32x1xi32>
    %194 = arith.cmpi slt, %192, %193 : vector<32x1xi32>
    %195 = arith.andi %190, %194 : vector<32x1xi1>
    %cst_96 = arith.constant 0.000000e+00 : f32
    %196 = vector.shape_cast %195 : vector<32x1xi1> to vector<32x1xi1>
    %197 = vector.broadcast %196 : vector<32x1xi1> to vector<32x4xi1>
    %198 = vector.broadcast %cst_96 : f32 to vector<32x4xf32>
    %199 = arith.select %197, %186, %198 : vector<32x4xi1>, vector<32x4xf32>
    %c0_97 = arith.constant 0 : index
    %c12 = arith.constant 12 : index
    %200 = vector.load %arg16[%c0_97, %c12] : memref<32x44xf32, #tpu.memory_space<vmem>>, vector<32x4xf32>
    tpu.vector_store %arg16[%c0_97, %c12], %199 {strides = array<i32>} : memref<32x44xf32, #tpu.memory_space<vmem>>, vector<32x4xf32>,
    %c4_98 = arith.constant 4 : index
    %c0_99 = arith.constant 0 : index
    %201 = vector.load %arg14[%c4_98, %c0_99] : memref<42x16xf32, #tpu.memory_space<vmem>>, vector<32x4xf32>
    %c-1_i32_100 = arith.constant -1 : i32
    %202 = vector.broadcast %c-1_i32_100 : i32 to vector<32x1xi32>
    %203 = arith.addi %17, %202 : vector<32x1xi32>
    %c0_i32_101 = arith.constant 0 : i32
    %204 = vector.broadcast %c0_i32_101 : i32 to vector<32x1xi32>
    %205 = arith.cmpi sge, %203, %204 : vector<32x1xi32>
    %c-1_i32_102 = arith.constant -1 : i32
    %206 = vector.broadcast %c-1_i32_102 : i32 to vector<32x1xi32>
    %207 = arith.addi %17, %206 : vector<32x1xi32>
    %c16_i32_103 = arith.constant 16 : i32
    %208 = vector.broadcast %c16_i32_103 : i32 to vector<32x1xi32>
    %209 = arith.cmpi slt, %207, %208 : vector<32x1xi32>
    %210 = arith.andi %205, %209 : vector<32x1xi1>
    %cst_104 = arith.constant 0.000000e+00 : f32
    %211 = vector.shape_cast %210 : vector<32x1xi1> to vector<32x1xi1>
    %212 = vector.broadcast %211 : vector<32x1xi1> to vector<32x4xi1>
    %213 = vector.broadcast %cst_104 : f32 to vector<32x4xf32>
    %214 = arith.select %212, %201, %213 : vector<32x4xi1>, vector<32x4xf32>
    %c0_105 = arith.constant 0 : index
    %c16_106 = arith.constant 16 : index
    %215 = vector.load %arg16[%c0_105, %c16_106] : memref<32x44xf32, #tpu.memory_space<vmem>>, vector<32x4xf32>
    tpu.vector_store %arg16[%c0_105, %c16_106], %214 {strides = array<i32>} : memref<32x44xf32, #tpu.memory_space<vmem>>, vector<32x4xf32>,
    %c5_107 = arith.constant 5 : index
    %c0_108 = arith.constant 0 : index
    %216 = vector.load %arg14[%c5_107, %c0_108] : memref<42x16xf32, #tpu.memory_space<vmem>>, vector<32x4xf32>
    %c0_i32_109 = arith.constant 0 : i32
    %217 = vector.broadcast %c0_i32_109 : i32 to vector<32x1xi32>
    %218 = arith.addi %17, %217 : vector<32x1xi32>
    %c0_i32_110 = arith.constant 0 : i32
    %219 = vector.broadcast %c0_i32_110 : i32 to vector<32x1xi32>
    %220 = arith.cmpi sge, %218, %219 : vector<32x1xi32>
    %c0_i32_111 = arith.constant 0 : i32
    %221 = vector.broadcast %c0_i32_111 : i32 to vector<32x1xi32>
    %222 = arith.addi %17, %221 : vector<32x1xi32>
    %c16_i32_112 = arith.constant 16 : i32
    %223 = vector.broadcast %c16_i32_112 : i32 to vector<32x1xi32>
    %224 = arith.cmpi slt, %222, %223 : vector<32x1xi32>
    %225 = arith.andi %220, %224 : vector<32x1xi1>
    %cst_113 = arith.constant 0.000000e+00 : f32
    %226 = vector.shape_cast %225 : vector<32x1xi1> to vector<32x1xi1>
    %227 = vector.broadcast %226 : vector<32x1xi1> to vector<32x4xi1>
    %228 = vector.broadcast %cst_113 : f32 to vector<32x4xf32>
    %229 = arith.select %227, %216, %228 : vector<32x4xi1>, vector<32x4xf32>
    %c0_114 = arith.constant 0 : index
    %c20 = arith.constant 20 : index
    %230 = vector.load %arg16[%c0_114, %c20] : memref<32x44xf32, #tpu.memory_space<vmem>>, vector<32x4xf32>
    tpu.vector_store %arg16[%c0_114, %c20], %229 {strides = array<i32>} : memref<32x44xf32, #tpu.memory_space<vmem>>, vector<32x4xf32>,
    %c6_115 = arith.constant 6 : index
    %c0_116 = arith.constant 0 : index
    %231 = vector.load %arg14[%c6_115, %c0_116] : memref<42x16xf32, #tpu.memory_space<vmem>>, vector<32x4xf32>
    %c1_i32_117 = arith.constant 1 : i32
    %232 = vector.broadcast %c1_i32_117 : i32 to vector<32x1xi32>
    %233 = arith.addi %17, %232 : vector<32x1xi32>
    %c0_i32_118 = arith.constant 0 : i32
    %234 = vector.broadcast %c0_i32_118 : i32 to vector<32x1xi32>
    %235 = arith.cmpi sge, %233, %234 : vector<32x1xi32>
    %c1_i32_119 = arith.constant 1 : i32
    %236 = vector.broadcast %c1_i32_119 : i32 to vector<32x1xi32>
    %237 = arith.addi %17, %236 : vector<32x1xi32>
    %c16_i32_120 = arith.constant 16 : i32
    %238 = vector.broadcast %c16_i32_120 : i32 to vector<32x1xi32>
    %239 = arith.cmpi slt, %237, %238 : vector<32x1xi32>
    %240 = arith.andi %235, %239 : vector<32x1xi1>
    %cst_121 = arith.constant 0.000000e+00 : f32
    %241 = vector.shape_cast %240 : vector<32x1xi1> to vector<32x1xi1>
    %242 = vector.broadcast %241 : vector<32x1xi1> to vector<32x4xi1>
    %243 = vector.broadcast %cst_121 : f32 to vector<32x4xf32>
    %244 = arith.select %242, %231, %243 : vector<32x4xi1>, vector<32x4xf32>
    %c0_122 = arith.constant 0 : index
    %c24 = arith.constant 24 : index
    %245 = vector.load %arg16[%c0_122, %c24] : memref<32x44xf32, #tpu.memory_space<vmem>>, vector<32x4xf32>
    tpu.vector_store %arg16[%c0_122, %c24], %244 {strides = array<i32>} : memref<32x44xf32, #tpu.memory_space<vmem>>, vector<32x4xf32>,
    %c7_123 = arith.constant 7 : index
    %c0_124 = arith.constant 0 : index
    %246 = vector.load %arg14[%c7_123, %c0_124] : memref<42x16xf32, #tpu.memory_space<vmem>>, vector<32x4xf32>
    %c2_i32_125 = arith.constant 2 : i32
    %247 = vector.broadcast %c2_i32_125 : i32 to vector<32x1xi32>
    %248 = arith.addi %17, %247 : vector<32x1xi32>
    %c0_i32_126 = arith.constant 0 : i32
    %249 = vector.broadcast %c0_i32_126 : i32 to vector<32x1xi32>
    %250 = arith.cmpi sge, %248, %249 : vector<32x1xi32>
    %c2_i32_127 = arith.constant 2 : i32
    %251 = vector.broadcast %c2_i32_127 : i32 to vector<32x1xi32>
    %252 = arith.addi %17, %251 : vector<32x1xi32>
    %c16_i32_128 = arith.constant 16 : i32
    %253 = vector.broadcast %c16_i32_128 : i32 to vector<32x1xi32>
    %254 = arith.cmpi slt, %252, %253 : vector<32x1xi32>
    %255 = arith.andi %250, %254 : vector<32x1xi1>
    %cst_129 = arith.constant 0.000000e+00 : f32
    %256 = vector.shape_cast %255 : vector<32x1xi1> to vector<32x1xi1>
    %257 = vector.broadcast %256 : vector<32x1xi1> to vector<32x4xi1>
    %258 = vector.broadcast %cst_129 : f32 to vector<32x4xf32>
    %259 = arith.select %257, %246, %258 : vector<32x4xi1>, vector<32x4xf32>
    %c0_130 = arith.constant 0 : index
    %c28 = arith.constant 28 : index
    %260 = vector.load %arg16[%c0_130, %c28] : memref<32x44xf32, #tpu.memory_space<vmem>>, vector<32x4xf32>
    tpu.vector_store %arg16[%c0_130, %c28], %259 {strides = array<i32>} : memref<32x44xf32, #tpu.memory_space<vmem>>, vector<32x4xf32>,
    %c8_131 = arith.constant 8 : index
    %c0_132 = arith.constant 0 : index
    %261 = vector.load %arg14[%c8_131, %c0_132] : memref<42x16xf32, #tpu.memory_space<vmem>>, vector<32x4xf32>
    %c3_i32_133 = arith.constant 3 : i32
    %262 = vector.broadcast %c3_i32_133 : i32 to vector<32x1xi32>
    %263 = arith.addi %17, %262 : vector<32x1xi32>
    %c0_i32_134 = arith.constant 0 : i32
    %264 = vector.broadcast %c0_i32_134 : i32 to vector<32x1xi32>
    %265 = arith.cmpi sge, %263, %264 : vector<32x1xi32>
    %c3_i32_135 = arith.constant 3 : i32
    %266 = vector.broadcast %c3_i32_135 : i32 to vector<32x1xi32>
    %267 = arith.addi %17, %266 : vector<32x1xi32>
    %c16_i32_136 = arith.constant 16 : i32
    %268 = vector.broadcast %c16_i32_136 : i32 to vector<32x1xi32>
    %269 = arith.cmpi slt, %267, %268 : vector<32x1xi32>
    %270 = arith.andi %265, %269 : vector<32x1xi1>
    %cst_137 = arith.constant 0.000000e+00 : f32
    %271 = vector.shape_cast %270 : vector<32x1xi1> to vector<32x1xi1>
    %272 = vector.broadcast %271 : vector<32x1xi1> to vector<32x4xi1>
    %273 = vector.broadcast %cst_137 : f32 to vector<32x4xf32>
    %274 = arith.select %272, %261, %273 : vector<32x4xi1>, vector<32x4xf32>
    %c0_138 = arith.constant 0 : index
    %c32_139 = arith.constant 32 : index
    %275 = vector.load %arg16[%c0_138, %c32_139] : memref<32x44xf32, #tpu.memory_space<vmem>>, vector<32x4xf32>
    tpu.vector_store %arg16[%c0_138, %c32_139], %274 {strides = array<i32>} : memref<32x44xf32, #tpu.memory_space<vmem>>, vector<32x4xf32>,
    %c9 = arith.constant 9 : index
    %c0_140 = arith.constant 0 : index
    %276 = vector.load %arg14[%c9, %c0_140] : memref<42x16xf32, #tpu.memory_space<vmem>>, vector<32x4xf32>
    %c4_i32 = arith.constant 4 : i32
    %277 = vector.broadcast %c4_i32 : i32 to vector<32x1xi32>
    %278 = arith.addi %17, %277 : vector<32x1xi32>
    %c0_i32_141 = arith.constant 0 : i32
    %279 = vector.broadcast %c0_i32_141 : i32 to vector<32x1xi32>
    %280 = arith.cmpi sge, %278, %279 : vector<32x1xi32>
    %c4_i32_142 = arith.constant 4 : i32
    %281 = vector.broadcast %c4_i32_142 : i32 to vector<32x1xi32>
    %282 = arith.addi %17, %281 : vector<32x1xi32>
    %c16_i32_143 = arith.constant 16 : i32
    %283 = vector.broadcast %c16_i32_143 : i32 to vector<32x1xi32>
    %284 = arith.cmpi slt, %282, %283 : vector<32x1xi32>
    %285 = arith.andi %280, %284 : vector<32x1xi1>
    %cst_144 = arith.constant 0.000000e+00 : f32
    %286 = vector.shape_cast %285 : vector<32x1xi1> to vector<32x1xi1>
    %287 = vector.broadcast %286 : vector<32x1xi1> to vector<32x4xi1>
    %288 = vector.broadcast %cst_144 : f32 to vector<32x4xf32>
    %289 = arith.select %287, %276, %288 : vector<32x4xi1>, vector<32x4xf32>
    %c0_145 = arith.constant 0 : index
    %c36 = arith.constant 36 : index
    %290 = vector.load %arg16[%c0_145, %c36] : memref<32x44xf32, #tpu.memory_space<vmem>>, vector<32x4xf32>
    tpu.vector_store %arg16[%c0_145, %c36], %289 {strides = array<i32>} : memref<32x44xf32, #tpu.memory_space<vmem>>, vector<32x4xf32>,
    %c10 = arith.constant 10 : index
    %c0_146 = arith.constant 0 : index
    %291 = vector.load %arg14[%c10, %c0_146] : memref<42x16xf32, #tpu.memory_space<vmem>>, vector<32x4xf32>
    %c5_i32 = arith.constant 5 : i32
    %292 = vector.broadcast %c5_i32 : i32 to vector<32x1xi32>
    %293 = arith.addi %17, %292 : vector<32x1xi32>
    %c0_i32_147 = arith.constant 0 : i32
    %294 = vector.broadcast %c0_i32_147 : i32 to vector<32x1xi32>
    %295 = arith.cmpi sge, %293, %294 : vector<32x1xi32>
    %c5_i32_148 = arith.constant 5 : i32
    %296 = vector.broadcast %c5_i32_148 : i32 to vector<32x1xi32>
    %297 = arith.addi %17, %296 : vector<32x1xi32>
    %c16_i32_149 = arith.constant 16 : i32
    %298 = vector.broadcast %c16_i32_149 : i32 to vector<32x1xi32>
    %299 = arith.cmpi slt, %297, %298 : vector<32x1xi32>
    %300 = arith.andi %295, %299 : vector<32x1xi1>
    %cst_150 = arith.constant 0.000000e+00 : f32
    %301 = vector.shape_cast %300 : vector<32x1xi1> to vector<32x1xi1>
    %302 = vector.broadcast %301 : vector<32x1xi1> to vector<32x4xi1>
    %303 = vector.broadcast %cst_150 : f32 to vector<32x4xf32>
    %304 = arith.select %302, %291, %303 : vector<32x4xi1>, vector<32x4xf32>
    %c0_151 = arith.constant 0 : index
    %c40 = arith.constant 40 : index
    %305 = vector.load %arg16[%c0_151, %c40] : memref<32x44xf32, #tpu.memory_space<vmem>>, vector<32x4xf32>
    tpu.vector_store %arg16[%c0_151, %c40], %304 {strides = array<i32>} : memref<32x44xf32, #tpu.memory_space<vmem>>, vector<32x4xf32>,
    %c0_152 = arith.constant 0 : index
    %c0_153 = arith.constant 0 : index
    %306 = vector.load %arg16[%c0_152, %c0_153] : memref<32x44xf32, #tpu.memory_space<vmem>>, vector<32x44xf32>
    %c0_154 = arith.constant 0 : index
    %c0_155 = arith.constant 0 : index
    %307 = vector.load %arg5[%c0_154, %c0_155] : memref<44x4xf32, #tpu.memory_space<vmem>>, vector<44x4xf32>
    %cst_156 = arith.constant dense<0.000000e+00> : vector<32x4xf32>
    %308 = tpu.matmul %306, %307, %cst_156 {dimension_numbers = #tpu.dot_dimension_numbers<[1], [0], [0], [1], [0, 0, 1, 1], [], []>} : vector<32x44xf32>, vector<44x4xf32>, vector<32x4xf32> -> vector<32x4xf32>
    %c0_157 = arith.constant 0 : index
    %c0_158 = arith.constant 0 : index
    %309 = vector.load %arg6[%c0_157, %c0_158] : memref<1x4xf32, #tpu.memory_space<vmem>>, vector<1x4xf32>
    %310 = vector.broadcast %309 : vector<1x4xf32> to vector<32x4xf32>
    %311 = arith.mulf %308, %310 : vector<32x4xf32>
    %c0_159 = arith.constant 0 : index
    %c0_160 = arith.constant 0 : index
    %312 = vector.load %arg7[%c0_159, %c0_160] : memref<1x4xf32, #tpu.memory_space<vmem>>, vector<1x4xf32>
    %313 = vector.broadcast %312 : vector<1x4xf32> to vector<32x4xf32>
    %314 = arith.addf %311, %313 : vector<32x4xf32>
    %cst_161 = arith.constant 0.000000e+00 : f32
    %315 = vector.broadcast %cst_161 : f32 to vector<32x4xf32>
    %316 = arith.cmpf ogt, %314, %315 : vector<32x4xf32>
    %cst_162 = arith.constant 0.00999999977 : f32
    %317 = vector.broadcast %cst_162 : f32 to vector<32x4xf32>
    %318 = arith.mulf %317, %314 : vector<32x4xf32>
    %319 = arith.select %316, %314, %318 : vector<32x4xi1>, vector<32x4xf32>
    %c5_163 = arith.constant 5 : index
    %c0_164 = arith.constant 0 : index
    %320 = vector.load %arg14[%c5_163, %c0_164] : memref<42x16xf32, #tpu.memory_space<vmem>>, vector<32x4xf32>
    tpu.vector_store %arg14[%c5_163, %c0_164], %319 {strides = array<i32>} : memref<42x16xf32, #tpu.memory_space<vmem>>, vector<32x4xf32>,
    %c2_165 = arith.constant 2 : index
    %c0_166 = arith.constant 0 : index
    %321 = vector.load %arg14[%c2_165, %c0_166] : memref<42x16xf32, #tpu.memory_space<vmem>>, vector<32x4xf32>
    %c-3_i32_167 = arith.constant -3 : i32
    %322 = vector.broadcast %c-3_i32_167 : i32 to vector<32x1xi32>
    %323 = arith.addi %17, %322 : vector<32x1xi32>
    %c0_i32_168 = arith.constant 0 : i32
    %324 = vector.broadcast %c0_i32_168 : i32 to vector<32x1xi32>
    %325 = arith.cmpi sge, %323, %324 : vector<32x1xi32>
    %c-3_i32_169 = arith.constant -3 : i32
    %326 = vector.broadcast %c-3_i32_169 : i32 to vector<32x1xi32>
    %327 = arith.addi %17, %326 : vector<32x1xi32>
    %c16_i32_170 = arith.constant 16 : i32
    %328 = vector.broadcast %c16_i32_170 : i32 to vector<32x1xi32>
    %329 = arith.cmpi slt, %327, %328 : vector<32x1xi32>
    %330 = arith.andi %325, %329 : vector<32x1xi1>
    %cst_171 = arith.constant 0.000000e+00 : f32
    %331 = vector.shape_cast %330 : vector<32x1xi1> to vector<32x1xi1>
    %332 = vector.broadcast %331 : vector<32x1xi1> to vector<32x4xi1>
    %333 = vector.broadcast %cst_171 : f32 to vector<32x4xf32>
    %334 = arith.select %332, %321, %333 : vector<32x4xi1>, vector<32x4xf32>
    %c0_172 = arith.constant 0 : index
    %c0_173 = arith.constant 0 : index
    %335 = vector.load %arg17[%c0_172, %c0_173] : memref<32x28xf32, #tpu.memory_space<vmem>>, vector<32x4xf32>
    tpu.vector_store %arg17[%c0_172, %c0_173], %334 {strides = array<i32>} : memref<32x28xf32, #tpu.memory_space<vmem>>, vector<32x4xf32>,
    %c3_174 = arith.constant 3 : index
    %c0_175 = arith.constant 0 : index
    %336 = vector.load %arg14[%c3_174, %c0_175] : memref<42x16xf32, #tpu.memory_space<vmem>>, vector<32x4xf32>
    %c-2_i32_176 = arith.constant -2 : i32
    %337 = vector.broadcast %c-2_i32_176 : i32 to vector<32x1xi32>
    %338 = arith.addi %17, %337 : vector<32x1xi32>
    %c0_i32_177 = arith.constant 0 : i32
    %339 = vector.broadcast %c0_i32_177 : i32 to vector<32x1xi32>
    %340 = arith.cmpi sge, %338, %339 : vector<32x1xi32>
    %c-2_i32_178 = arith.constant -2 : i32
    %341 = vector.broadcast %c-2_i32_178 : i32 to vector<32x1xi32>
    %342 = arith.addi %17, %341 : vector<32x1xi32>
    %c16_i32_179 = arith.constant 16 : i32
    %343 = vector.broadcast %c16_i32_179 : i32 to vector<32x1xi32>
    %344 = arith.cmpi slt, %342, %343 : vector<32x1xi32>
    %345 = arith.andi %340, %344 : vector<32x1xi1>
    %cst_180 = arith.constant 0.000000e+00 : f32
    %346 = vector.shape_cast %345 : vector<32x1xi1> to vector<32x1xi1>
    %347 = vector.broadcast %346 : vector<32x1xi1> to vector<32x4xi1>
    %348 = vector.broadcast %cst_180 : f32 to vector<32x4xf32>
    %349 = arith.select %347, %336, %348 : vector<32x4xi1>, vector<32x4xf32>
    %c0_181 = arith.constant 0 : index
    %c4_182 = arith.constant 4 : index
    %350 = vector.load %arg17[%c0_181, %c4_182] : memref<32x28xf32, #tpu.memory_space<vmem>>, vector<32x4xf32>
    tpu.vector_store %arg17[%c0_181, %c4_182], %349 {strides = array<i32>} : memref<32x28xf32, #tpu.memory_space<vmem>>, vector<32x4xf32>,
    %c4_183 = arith.constant 4 : index
    %c0_184 = arith.constant 0 : index
    %351 = vector.load %arg14[%c4_183, %c0_184] : memref<42x16xf32, #tpu.memory_space<vmem>>, vector<32x4xf32>
    %c-1_i32_185 = arith.constant -1 : i32
    %352 = vector.broadcast %c-1_i32_185 : i32 to vector<32x1xi32>
    %353 = arith.addi %17, %352 : vector<32x1xi32>
    %c0_i32_186 = arith.constant 0 : i32
    %354 = vector.broadcast %c0_i32_186 : i32 to vector<32x1xi32>
    %355 = arith.cmpi sge, %353, %354 : vector<32x1xi32>
    %c-1_i32_187 = arith.constant -1 : i32
    %356 = vector.broadcast %c-1_i32_187 : i32 to vector<32x1xi32>
    %357 = arith.addi %17, %356 : vector<32x1xi32>
    %c16_i32_188 = arith.constant 16 : i32
    %358 = vector.broadcast %c16_i32_188 : i32 to vector<32x1xi32>
    %359 = arith.cmpi slt, %357, %358 : vector<32x1xi32>
    %360 = arith.andi %355, %359 : vector<32x1xi1>
    %cst_189 = arith.constant 0.000000e+00 : f32
    %361 = vector.shape_cast %360 : vector<32x1xi1> to vector<32x1xi1>
    %362 = vector.broadcast %361 : vector<32x1xi1> to vector<32x4xi1>
    %363 = vector.broadcast %cst_189 : f32 to vector<32x4xf32>
    %364 = arith.select %362, %351, %363 : vector<32x4xi1>, vector<32x4xf32>
    %c0_190 = arith.constant 0 : index
    %c8_191 = arith.constant 8 : index
    %365 = vector.load %arg17[%c0_190, %c8_191] : memref<32x28xf32, #tpu.memory_space<vmem>>, vector<32x4xf32>
    tpu.vector_store %arg17[%c0_190, %c8_191], %364 {strides = array<i32>} : memref<32x28xf32, #tpu.memory_space<vmem>>, vector<32x4xf32>,
    %c5_192 = arith.constant 5 : index
    %c0_193 = arith.constant 0 : index
    %366 = vector.load %arg14[%c5_192, %c0_193] : memref<42x16xf32, #tpu.memory_space<vmem>>, vector<32x4xf32>
    %c0_i32_194 = arith.constant 0 : i32
    %367 = vector.broadcast %c0_i32_194 : i32 to vector<32x1xi32>
    %368 = arith.addi %17, %367 : vector<32x1xi32>
    %c0_i32_195 = arith.constant 0 : i32
    %369 = vector.broadcast %c0_i32_195 : i32 to vector<32x1xi32>
    %370 = arith.cmpi sge, %368, %369 : vector<32x1xi32>
    %c0_i32_196 = arith.constant 0 : i32
    %371 = vector.broadcast %c0_i32_196 : i32 to vector<32x1xi32>
    %372 = arith.addi %17, %371 : vector<32x1xi32>
    %c16_i32_197 = arith.constant 16 : i32
    %373 = vector.broadcast %c16_i32_197 : i32 to vector<32x1xi32>
    %374 = arith.cmpi slt, %372, %373 : vector<32x1xi32>
    %375 = arith.andi %370, %374 : vector<32x1xi1>
    %cst_198 = arith.constant 0.000000e+00 : f32
    %376 = vector.shape_cast %375 : vector<32x1xi1> to vector<32x1xi1>
    %377 = vector.broadcast %376 : vector<32x1xi1> to vector<32x4xi1>
    %378 = vector.broadcast %cst_198 : f32 to vector<32x4xf32>
    %379 = arith.select %377, %366, %378 : vector<32x4xi1>, vector<32x4xf32>
    %c0_199 = arith.constant 0 : index
    %c12_200 = arith.constant 12 : index
    %380 = vector.load %arg17[%c0_199, %c12_200] : memref<32x28xf32, #tpu.memory_space<vmem>>, vector<32x4xf32>
    tpu.vector_store %arg17[%c0_199, %c12_200], %379 {strides = array<i32>} : memref<32x28xf32, #tpu.memory_space<vmem>>, vector<32x4xf32>,
    %c6_201 = arith.constant 6 : index
    %c0_202 = arith.constant 0 : index
    %381 = vector.load %arg14[%c6_201, %c0_202] : memref<42x16xf32, #tpu.memory_space<vmem>>, vector<32x4xf32>
    %c1_i32_203 = arith.constant 1 : i32
    %382 = vector.broadcast %c1_i32_203 : i32 to vector<32x1xi32>
    %383 = arith.addi %17, %382 : vector<32x1xi32>
    %c0_i32_204 = arith.constant 0 : i32
    %384 = vector.broadcast %c0_i32_204 : i32 to vector<32x1xi32>
    %385 = arith.cmpi sge, %383, %384 : vector<32x1xi32>
    %c1_i32_205 = arith.constant 1 : i32
    %386 = vector.broadcast %c1_i32_205 : i32 to vector<32x1xi32>
    %387 = arith.addi %17, %386 : vector<32x1xi32>
    %c16_i32_206 = arith.constant 16 : i32
    %388 = vector.broadcast %c16_i32_206 : i32 to vector<32x1xi32>
    %389 = arith.cmpi slt, %387, %388 : vector<32x1xi32>
    %390 = arith.andi %385, %389 : vector<32x1xi1>
    %cst_207 = arith.constant 0.000000e+00 : f32
    %391 = vector.shape_cast %390 : vector<32x1xi1> to vector<32x1xi1>
    %392 = vector.broadcast %391 : vector<32x1xi1> to vector<32x4xi1>
    %393 = vector.broadcast %cst_207 : f32 to vector<32x4xf32>
    %394 = arith.select %392, %381, %393 : vector<32x4xi1>, vector<32x4xf32>
    %c0_208 = arith.constant 0 : index
    %c16_209 = arith.constant 16 : index
    %395 = vector.load %arg17[%c0_208, %c16_209] : memref<32x28xf32, #tpu.memory_space<vmem>>, vector<32x4xf32>
    tpu.vector_store %arg17[%c0_208, %c16_209], %394 {strides = array<i32>} : memref<32x28xf32, #tpu.memory_space<vmem>>, vector<32x4xf32>,
    %c7_210 = arith.constant 7 : index
    %c0_211 = arith.constant 0 : index
    %396 = vector.load %arg14[%c7_210, %c0_211] : memref<42x16xf32, #tpu.memory_space<vmem>>, vector<32x4xf32>
    %c2_i32_212 = arith.constant 2 : i32
    %397 = vector.broadcast %c2_i32_212 : i32 to vector<32x1xi32>
    %398 = arith.addi %17, %397 : vector<32x1xi32>
    %c0_i32_213 = arith.constant 0 : i32
    %399 = vector.broadcast %c0_i32_213 : i32 to vector<32x1xi32>
    %400 = arith.cmpi sge, %398, %399 : vector<32x1xi32>
    %c2_i32_214 = arith.constant 2 : i32
    %401 = vector.broadcast %c2_i32_214 : i32 to vector<32x1xi32>
    %402 = arith.addi %17, %401 : vector<32x1xi32>
    %c16_i32_215 = arith.constant 16 : i32
    %403 = vector.broadcast %c16_i32_215 : i32 to vector<32x1xi32>
    %404 = arith.cmpi slt, %402, %403 : vector<32x1xi32>
    %405 = arith.andi %400, %404 : vector<32x1xi1>
    %cst_216 = arith.constant 0.000000e+00 : f32
    %406 = vector.shape_cast %405 : vector<32x1xi1> to vector<32x1xi1>
    %407 = vector.broadcast %406 : vector<32x1xi1> to vector<32x4xi1>
    %408 = vector.broadcast %cst_216 : f32 to vector<32x4xf32>
    %409 = arith.select %407, %396, %408 : vector<32x4xi1>, vector<32x4xf32>
    %c0_217 = arith.constant 0 : index
    %c20_218 = arith.constant 20 : index
    %410 = vector.load %arg17[%c0_217, %c20_218] : memref<32x28xf32, #tpu.memory_space<vmem>>, vector<32x4xf32>
    tpu.vector_store %arg17[%c0_217, %c20_218], %409 {strides = array<i32>} : memref<32x28xf32, #tpu.memory_space<vmem>>, vector<32x4xf32>,
    %c8_219 = arith.constant 8 : index
    %c0_220 = arith.constant 0 : index
    %411 = vector.load %arg14[%c8_219, %c0_220] : memref<42x16xf32, #tpu.memory_space<vmem>>, vector<32x4xf32>
    %c3_i32_221 = arith.constant 3 : i32
    %412 = vector.broadcast %c3_i32_221 : i32 to vector<32x1xi32>
    %413 = arith.addi %17, %412 : vector<32x1xi32>
    %c0_i32_222 = arith.constant 0 : i32
    %414 = vector.broadcast %c0_i32_222 : i32 to vector<32x1xi32>
    %415 = arith.cmpi sge, %413, %414 : vector<32x1xi32>
    %c3_i32_223 = arith.constant 3 : i32
    %416 = vector.broadcast %c3_i32_223 : i32 to vector<32x1xi32>
    %417 = arith.addi %17, %416 : vector<32x1xi32>
    %c16_i32_224 = arith.constant 16 : i32
    %418 = vector.broadcast %c16_i32_224 : i32 to vector<32x1xi32>
    %419 = arith.cmpi slt, %417, %418 : vector<32x1xi32>
    %420 = arith.andi %415, %419 : vector<32x1xi1>
    %cst_225 = arith.constant 0.000000e+00 : f32
    %421 = vector.shape_cast %420 : vector<32x1xi1> to vector<32x1xi1>
    %422 = vector.broadcast %421 : vector<32x1xi1> to vector<32x4xi1>
    %423 = vector.broadcast %cst_225 : f32 to vector<32x4xf32>
    %424 = arith.select %422, %411, %423 : vector<32x4xi1>, vector<32x4xf32>
    %c0_226 = arith.constant 0 : index
    %c24_227 = arith.constant 24 : index
    %425 = vector.load %arg17[%c0_226, %c24_227] : memref<32x28xf32, #tpu.memory_space<vmem>>, vector<32x4xf32>
    tpu.vector_store %arg17[%c0_226, %c24_227], %424 {strides = array<i32>} : memref<32x28xf32, #tpu.memory_space<vmem>>, vector<32x4xf32>,
    %c0_228 = arith.constant 0 : index
    %c0_229 = arith.constant 0 : index
    %426 = vector.load %arg17[%c0_228, %c0_229] : memref<32x28xf32, #tpu.memory_space<vmem>>, vector<32x28xf32>
    %c0_230 = arith.constant 0 : index
    %c0_231 = arith.constant 0 : index
    %427 = vector.load %arg8[%c0_230, %c0_231] : memref<28x16xf32, #tpu.memory_space<vmem>>, vector<28x16xf32>
    %cst_232 = arith.constant dense<0.000000e+00> : vector<32x16xf32>
    %428 = tpu.matmul %426, %427, %cst_232 {dimension_numbers = #tpu.dot_dimension_numbers<[1], [0], [0], [1], [0, 0, 1, 1], [], []>} : vector<32x28xf32>, vector<28x16xf32>, vector<32x16xf32> -> vector<32x16xf32>
    %c0_233 = arith.constant 0 : index
    %c0_234 = arith.constant 0 : index
    %429 = vector.load %arg9[%c0_233, %c0_234] : memref<1x16xf32, #tpu.memory_space<vmem>>, vector<1x16xf32>
    %430 = vector.broadcast %429 : vector<1x16xf32> to vector<32x16xf32>
    %431 = arith.mulf %428, %430 : vector<32x16xf32>
    %c0_235 = arith.constant 0 : index
    %c0_236 = arith.constant 0 : index
    %432 = vector.load %arg10[%c0_235, %c0_236] : memref<1x16xf32, #tpu.memory_space<vmem>>, vector<1x16xf32>
    %433 = vector.broadcast %432 : vector<1x16xf32> to vector<32x16xf32>
    %434 = arith.addf %431, %433 : vector<32x16xf32>
    %c0_237 = arith.constant 0 : index
    %c0_238 = arith.constant 0 : index
    %435 = vector.load %arg11[%c0_237, %c0_238] : memref<1x16xf32, #tpu.memory_space<vmem>>, vector<1x16xf32>
    %c0_239 = arith.constant 0 : index
    %c0_240 = arith.constant 0 : index
    %436 = vector.load %arg12[%c0_239, %c0_240] : memref<1x16xf32, #tpu.memory_space<vmem>>, vector<1x16xf32>
    %437 = vector.extract_strided_slice %434 {offsets = [0, 0], sizes = [16, 16], strides = [1, 1]} : vector<32x16xf32> to vector<16x16xf32>
    %cst_241 = arith.constant dense<0.000000e+00> : vector<16xf32>
    %438 = vector.multi_reduction <add>, %437, %cst_241 [0] : vector<16x16xf32> to vector<16xf32>
    %439 = vector.shape_cast %438 : vector<16xf32> to vector<1x16xf32>
    %cst_242 = arith.constant 1.600000e+01 : f32
    %440 = vector.broadcast %cst_242 : f32 to vector<1x16xf32>
    %441 = arith.divf %439, %440 : vector<1x16xf32>
    %442 = arith.mulf %441, %435 : vector<1x16xf32>
    %cst_243 = arith.constant dense<0.000000e+00> : vector<1xf32>
    %443 = vector.multi_reduction <add>, %442, %cst_243 [1] : vector<1x16xf32> to vector<1xf32>
    %444 = vector.shape_cast %443 : vector<1xf32> to vector<1x1xf32>
    %cst_244 = arith.constant 0.000000e+00 : f32
    %445 = vector.broadcast %cst_244 : f32 to vector<1x1xf32>
    %446 = arith.cmpf ogt, %444, %445 : vector<1x1xf32>
    %cst_245 = arith.constant 0.00999999977 : f32
    %447 = vector.broadcast %cst_245 : f32 to vector<1x1xf32>
    %448 = arith.mulf %447, %444 : vector<1x1xf32>
    %449 = arith.select %446, %444, %448 : vector<1x1xi1>, vector<1x1xf32>
    %450 = vector.broadcast %449 : vector<1x1xf32> to vector<1x16xf32>
    %451 = arith.mulf %450, %436 : vector<1x16xf32>
    %452 = arith.negf %451 : vector<1x16xf32>
    %453 = math.exp %452 : vector<1x16xf32>
    %cst_246 = arith.constant 1.000000e+00 : f32
    %454 = vector.broadcast %cst_246 : f32 to vector<1x16xf32>
    %455 = arith.addf %454, %453 : vector<1x16xf32>
    %456 = arith.divf %454, %455 : vector<1x16xf32>
    %457 = vector.broadcast %456 : vector<1x16xf32> to vector<16x16xf32>
    %458 = arith.mulf %437, %457 : vector<16x16xf32>
    %459 = vector.extract_strided_slice %0 {offsets = [0, 0], sizes = [16, 16], strides = [1, 1]} : vector<32x16xf32> to vector<16x16xf32>
    %460 = arith.addf %458, %459 : vector<16x16xf32>
    %cst_247 = arith.constant 0.000000e+00 : f32
    %461 = vector.broadcast %cst_247 : f32 to vector<16x16xf32>
    %462 = arith.cmpf ogt, %460, %461 : vector<16x16xf32>
    %cst_248 = arith.constant 0.00999999977 : f32
    %463 = vector.broadcast %cst_248 : f32 to vector<16x16xf32>
    %464 = arith.mulf %463, %460 : vector<16x16xf32>
    %465 = arith.select %462, %460, %464 : vector<16x16xi1>, vector<16x16xf32>
    %c0_249 = arith.constant 0 : index
    %c0_250 = arith.constant 0 : index
    %466 = vector.load %arg13[%c0_249, %c0_250] : memref<32x16xf32, #tpu.memory_space<vmem>>, vector<16x16xf32>
    tpu.vector_store %arg13[%c0_249, %c0_250], %465 {strides = array<i32>} : memref<32x16xf32, #tpu.memory_space<vmem>>, vector<16x16xf32>,
    %467 = vector.extract_strided_slice %434 {offsets = [16, 0], sizes = [16, 16], strides = [1, 1]} : vector<32x16xf32> to vector<16x16xf32>
    %cst_251 = arith.constant dense<0.000000e+00> : vector<16xf32>
    %468 = vector.multi_reduction <add>, %467, %cst_251 [0] : vector<16x16xf32> to vector<16xf32>
    %469 = vector.shape_cast %468 : vector<16xf32> to vector<1x16xf32>
    %cst_252 = arith.constant 1.600000e+01 : f32
    %470 = vector.broadcast %cst_252 : f32 to vector<1x16xf32>
    %471 = arith.divf %469, %470 : vector<1x16xf32>
    %472 = arith.mulf %471, %435 : vector<1x16xf32>
    %cst_253 = arith.constant dense<0.000000e+00> : vector<1xf32>
    %473 = vector.multi_reduction <add>, %472, %cst_253 [1] : vector<1x16xf32> to vector<1xf32>
    %474 = vector.shape_cast %473 : vector<1xf32> to vector<1x1xf32>
    %cst_254 = arith.constant 0.000000e+00 : f32
    %475 = vector.broadcast %cst_254 : f32 to vector<1x1xf32>
    %476 = arith.cmpf ogt, %474, %475 : vector<1x1xf32>
    %cst_255 = arith.constant 0.00999999977 : f32
    %477 = vector.broadcast %cst_255 : f32 to vector<1x1xf32>
    %478 = arith.mulf %477, %474 : vector<1x1xf32>
    %479 = arith.select %476, %474, %478 : vector<1x1xi1>, vector<1x1xf32>
    %480 = vector.broadcast %479 : vector<1x1xf32> to vector<1x16xf32>
    %481 = arith.mulf %480, %436 : vector<1x16xf32>
    %482 = arith.negf %481 : vector<1x16xf32>
    %483 = math.exp %482 : vector<1x16xf32>
    %cst_256 = arith.constant 1.000000e+00 : f32
    %484 = vector.broadcast %cst_256 : f32 to vector<1x16xf32>
    %485 = arith.addf %484, %483 : vector<1x16xf32>
    %486 = arith.divf %484, %485 : vector<1x16xf32>
    %487 = vector.broadcast %486 : vector<1x16xf32> to vector<16x16xf32>
    %488 = arith.mulf %467, %487 : vector<16x16xf32>
    %489 = vector.extract_strided_slice %0 {offsets = [16, 0], sizes = [16, 16], strides = [1, 1]} : vector<32x16xf32> to vector<16x16xf32>
    %490 = arith.addf %488, %489 : vector<16x16xf32>
    %cst_257 = arith.constant 0.000000e+00 : f32
    %491 = vector.broadcast %cst_257 : f32 to vector<16x16xf32>
    %492 = arith.cmpf ogt, %490, %491 : vector<16x16xf32>
    %cst_258 = arith.constant 0.00999999977 : f32
    %493 = vector.broadcast %cst_258 : f32 to vector<16x16xf32>
    %494 = arith.mulf %493, %490 : vector<16x16xf32>
    %495 = arith.select %492, %490, %494 : vector<16x16xi1>, vector<16x16xf32>
    %c16_259 = arith.constant 16 : index
    %c0_260 = arith.constant 0 : index
    %496 = vector.load %arg13[%c16_259, %c0_260] : memref<32x16xf32, #tpu.memory_space<vmem>>, vector<16x16xf32>
    tpu.vector_store %arg13[%c16_259, %c0_260], %495 {strides = array<i32>} : memref<32x16xf32, #tpu.memory_space<vmem>>, vector<16x16xf32>,
    return
  }
  func.func @transform_0(%arg0: i32) -> (i32, i32) {
    %c0_i32 = arith.constant 0 : i32
    %c0_i32_0 = arith.constant 0 : i32
    return %arg0, %c0_i32 : i32, i32
  }
  func.func @transform_1(%arg0: i32) -> (i32, i32) {
    %c0_i32 = arith.constant 0 : i32
    %c0_i32_0 = arith.constant 0 : i32
    %c0_i32_1 = arith.constant 0 : i32
    return %c0_i32, %c0_i32_0 : i32, i32
  }
  func.func @transform_2(%arg0: i32) -> (i32, i32) {
    %c0_i32 = arith.constant 0 : i32
    %c0_i32_0 = arith.constant 0 : i32
    %c0_i32_1 = arith.constant 0 : i32
    return %c0_i32, %c0_i32_0 : i32, i32
  }
  func.func @transform_3(%arg0: i32) -> (i32, i32) {
    %c0_i32 = arith.constant 0 : i32
    %c0_i32_0 = arith.constant 0 : i32
    %c0_i32_1 = arith.constant 0 : i32
    return %c0_i32, %c0_i32_0 : i32, i32
  }
  func.func @transform_4(%arg0: i32) -> (i32, i32) {
    %c0_i32 = arith.constant 0 : i32
    %c0_i32_0 = arith.constant 0 : i32
    %c0_i32_1 = arith.constant 0 : i32
    return %c0_i32, %c0_i32_0 : i32, i32
  }
  func.func @transform_5(%arg0: i32) -> (i32, i32) {
    %c0_i32 = arith.constant 0 : i32
    %c0_i32_0 = arith.constant 0 : i32
    %c0_i32_1 = arith.constant 0 : i32
    return %c0_i32, %c0_i32_0 : i32, i32
  }
  func.func @transform_6(%arg0: i32) -> (i32, i32) {
    %c0_i32 = arith.constant 0 : i32
    %c0_i32_0 = arith.constant 0 : i32
    %c0_i32_1 = arith.constant 0 : i32
    return %c0_i32, %c0_i32_0 : i32, i32
  }
  func.func @transform_7(%arg0: i32) -> (i32, i32) {
    %c0_i32 = arith.constant 0 : i32
    %c0_i32_0 = arith.constant 0 : i32
    %c0_i32_1 = arith.constant 0 : i32
    return %c0_i32, %c0_i32_0 : i32, i32
  }
  func.func @transform_8(%arg0: i32) -> (i32, i32) {
    %c0_i32 = arith.constant 0 : i32
    %c0_i32_0 = arith.constant 0 : i32
    %c0_i32_1 = arith.constant 0 : i32
    return %c0_i32, %c0_i32_0 : i32, i32
  }
  func.func @transform_9(%arg0: i32) -> (i32, i32) {
    %c0_i32 = arith.constant 0 : i32
    %c0_i32_0 = arith.constant 0 : i32
    %c0_i32_1 = arith.constant 0 : i32
    return %c0_i32, %c0_i32_0 : i32, i32
  }
  func.func @transform_10(%arg0: i32) -> (i32, i32) {
    %c0_i32 = arith.constant 0 : i32
    %c0_i32_0 = arith.constant 0 : i32
    %c0_i32_1 = arith.constant 0 : i32
    return %c0_i32, %c0_i32_0 : i32, i32
  }
  func.func @transform_11(%arg0: i32) -> (i32, i32) {
    %c0_i32 = arith.constant 0 : i32
    %c0_i32_0 = arith.constant 0 : i32
    %c0_i32_1 = arith.constant 0 : i32
    return %c0_i32, %c0_i32_0 : i32, i32
  }
  func.func @transform_12(%arg0: i32) -> (i32, i32) {
    %c0_i32 = arith.constant 0 : i32
    %c0_i32_0 = arith.constant 0 : i32
    return %arg0, %c0_i32 : i32, i32
  }
}

</mosaic_0001>

<bundles_post_ra>
// kernel: tpu_custom_call.1
= control target key start
LH: loop header
LB: loop body
LE: loop exit
PB: predicated region body
PF: predicated region fallthrough
CT: control target
= control target key end

     0   :  { %vm2332_vm0 = vcmask 130048   ;;  %v45_v0 = vlaneseq  ;;  %v1709_v3 = vmov 0.0   ;;  %s1710_s30 = smov 16   ;;  %s1711_s13 = smov 32   ;;  %vm194_vm13 = vcmask 261248   ;;  %s2319_s0 = inlined_call_operand.vmem [shape: f32[32,16], index: 0, kind: input, shape index: {}]   ;;  %s2320_s1 = inlined_call_operand.vmem [shape: f32[112,4], index: 1, kind: input, shape index: {}]   ;;  %s2321_s2 = inlined_call_operand.vmem [shape: f32[1,4], index: 2, kind: input, shape index: {}]   ;;  %s2322_s3 = inlined_call_operand.vmem [shape: f32[1,4], index: 3, kind: input, shape index: {}]   ;;  %s2323_s4 = inlined_call_operand.vmem [shape: f32[44,4], index: 4, kind: input, shape index: {}]   ;;  %s2324_s5 = inlined_call_operand.vmem [shape: f32[1,4], index: 5, kind: input, shape index: {}]   ;;  %s2325_s6 = inlined_call_operand.vmem [shape: f32[1,4], index: 6, kind: input, shape index: {}]   ;;  %s2326_s7 = inlined_call_operand.vmem [shape: f32[28,16], index: 7, kind: input, shape index: {}]   ;;  %s2327_s8 = inlined_call_operand.vmem [shape: f32[1,16], index: 8, kind: input, shape index: {}]   ;;  %s2328_s9 = inlined_call_operand.vmem [shape: f32[1,16], index: 9, kind: input, shape index: {}]   ;;  %s2329_s10 = inlined_call_operand.vmem [shape: f32[1,16], index: 10, kind: input, shape index: {}]   ;;  %s2330_s11 = inlined_call_operand.vmem [shape: f32[1,16], index: 11, kind: input, shape index: {}]   ;;  %s2331_s12 = inlined_call_operand.vmem [shape: f32[32,16], index: 12, kind: output, shape index: {}]  }
   0x1   :  { %v1792_v1 = vld [vmem:[%s2319_s0] sm:$0xff]  ;;  %v1797_v2 = vld [vmem:[%s2319_s0 + $0x8] sm:$0xff]  ;;  %99 = vst.msk [vmem:[#allocation2] sm:$0xff] %vm2332_vm0, %v1709_v3  ;;  %100 = vst.msk [vmem:[#allocation2 + $0x8] sm:$0xff] %vm2332_vm0, %v1709_v3  ;;  %s1712_s14 = smov 48   ;;  %s1713_s21 = smov 64  }
   0x2   :  { %101 = vst.msk [vmem:[#allocation2 + $0x10] sm:$0xff] %vm2332_vm0, %v1709_v3  ;;  %103 = vst.msk [vmem:[#allocation2 + $0x20] sm:$0xff] %vm2332_vm0, %v1709_v3  ;;  %v1812_v4 = vld [vmem:[%s2319_s0 + $0x10] sm:$0xff]  ;;  %v1818_v5 = vshrl.u32 %v45_v0, 7  ;;  %v1825_v6 = vld [vmem:[%s2319_s0 + $0x18] sm:$0xff]  ;;  %s1714_s24 = smov 80  }
   0x3   :  { %102 = vst.msk [vmem:[#allocation2 + $0x18] sm:$0xff] %vm2332_vm0, %v1709_v3  ;;  %106 = vst.msk [vmem:[#allocation2 + $0x5] sm:$0xff] %vm2332_vm0, %v1792_v1  ;;  %v477_v13 = vld [vmem:[%s2320_s1 + $0x68] sm:$0xff]  ;;  %v476_v33 = vld [vmem:[%s2320_s1 + $0x60] sm:$0xff]  ;;  %s1715_s15 = smov 96   ;;  %vm247_vm14 = vcmask 392448  }
   0x4   :  { %107 = vst.msk [vmem:[#allocation2 + $0xd] sm:$0xff] %vm2332_vm0, %v1797_v2  ;;  %108 = vst.msk [vmem:[#allocation2 + $0x15] sm:$0xff] %vm2332_vm0, %v1812_v4  ;;  %v1830_v7 = vand.u32 15, %v1818_v5  ;;  %v48_v8 = vadd.s32 16, %v1818_v5  ;;  %v47_v12 = vadd.s32 8, %v1818_v5  ;;  %1620 = vmatprep.subr.mxu0 %v477_v13  ;;  %v475_v34 = vld [vmem:[%s2320_s1 + $0x58] sm:$0xff] }
   0x5   :  { %109 = vst.msk [vmem:[#allocation2 + $0x1d] sm:$0xff] %vm2332_vm0, %v1825_v6  ;;  %1621 = vmatpush3.msra.mxu0 %v477_v13  ;;  %v474_v40 = vld [vmem:[%s2320_s1 + $0x50] sm:$0xff]  ;;  %v473_v45 = vld [vmem:[%s2320_s1 + $0x48] sm:$0xff]  ;;  %v472_v46 = vld [vmem:[%s2320_s1 + $0x40] sm:$0xff]  ;;  %v49_v50 = vadd.s32 24, %v1818_v5  ;;  %vm296_vm15 = vcmask 523648  }
   0x6   :  { %v1834_v9 = vadd.s32 4294967294, %v1830_v7  ;;  %v1837_v10 = vadd.s32 4294967295, %v1830_v7  ;;  %v1839_v11 = vand.u32 15, %v48_v8  ;;  %v1848_v18 = vadd.s32 4294967293, %v1830_v7  ;;  %1622 = vmatprep.subr.mxu0 %v476_v33  ;;  %v471_v51 = vld [vmem:[%s2320_s1 + $0x38] sm:$0xff]  ;;  %v470_v56 = vld [vmem:[%s2320_s1 + $0x30] sm:$0xff] }
   0x7   :  { %v1855_v22 = vand.u32 15, %v47_v12  ;;  %1623 = vmatpush3.msra.mxu0 %v476_v33  ;;  %v1927_v55 = vand.u32 15, %v49_v50  ;;  %v469_v57 = vld [vmem:[%s2320_s1 + $0x28] sm:$0xff]  ;;  %v468_v62 = vld [vmem:[%s2320_s1 + $0x20] sm:$0xff]  ;;  %v467_v13 = vld [vmem:[%s2320_s1 + $0x18] sm:$0xff]  ;;  %s1718_s29 = smov 8  }
   0x8   :  { %vm154_vm1 = vcmp.ge.s32.totalorder %v1834_v9, 0  ;;  %vm207_vm2 = vcmp.ge.s32.totalorder %v1837_v10, 0  ;;  %v1853_v21 = vadd.s32 4294967294, %v1839_v11  ;;  %vm118_vm3 = vcmp.ge.s32.totalorder %v1848_v18, 0  ;;  %1624 = vmatprep.subr.mxu0 %v475_v34  ;;  %s1720_s16 = smov 24   ;;  %s1721_s17 = smov 28  }
   0x9   :  { %v1865_v25 = vadd.s32 4294967293, %v1839_v11  ;;  %v1869_v27 = vadd.s32 1, %v1855_v22  ;;  %v1892_v39 = vadd.s32 4294967295, %v1839_v11  ;;  %1625 = vmatpush3.msra.mxu0 %v475_v34  ;;  %v1903_v44 = vadd.s32 2, %v1855_v22  ;;  %s1722_s18 = smov 36   ;;  %s1723_s19 = smov 40  }
   0xa   :  { %v252_v16 = vld [vmem:[#allocation2 + $0x5] sm:$0xff]  ;;  %vm2334_vm4 = vcmp.ge.s32.totalorder %v1853_v21, 0  ;;  %1626 = vmatprep.subr.mxu0 %v474_v40  ;;  %v1925_v54 = vadd.s32 3, %v1855_v22  ;;  %v1939_v61 = vadd.s32 1, %v1927_v55  ;;  %v1950_v12 = vadd.s32 2, %v1927_v55 }
   0xb   :  { %v147_v14 = vld [vmem:[#allocation2 + $0xb] sm:$0xff]  ;;  %v146_v19 = vld [vmem:[#allocation2 + $0x3] sm:$0xff]  ;;  %v148_v26 = vld [vmem:[#allocation2 + $0x13] sm:$0xff]  ;;  %vm120_vm5 = vcmp.ge.s32.totalorder %v1865_v25, 0  ;;  %vm2339_vm6 = vcmp.lt.s32.totalorder %v1869_v27, 16  ;;  %vm2333_vm7 = vcmp.ge.s32.totalorder %v1892_v39, 0  ;;  %1627 = vmatpush3.msra.mxu0 %v474_v40 }
   0xc   :  { %v200_v15 = vld [vmem:[#allocation2 + $0xc] sm:$0xff]  ;;  %184 = vrot.lane.b32.xlu0 %v147_v14, %s1710_s30  ;;  %v199_v20 = vld [vmem:[#allocation2 + $0x4] sm:$0xff]  ;;  %v174_v23 = vsel %vm154_vm1, %v146_v19, 0.0  ;;  %v113_v35 = vld [vmem:[#allocation2 + $0x1a] sm:$0xff]  ;;  %v176_v37 = vsel %vm2334_vm4, %v148_v26, 0.0  ;;  %1628 = vmatprep.subr.mxu0 %v473_v45  ;;  %vm2338_vm8 = vcmp.lt.s32.totalorder %v1903_v44, 16 }
   0xd   :  { %237 = vrot.lane.b32.xlu1 %v200_v15, %s1711_s13  ;;  %v253_v17 = vld [vmem:[#allocation2 + $0xd] sm:$0xff]  ;;  %v227_v24 = vsel %vm207_vm2, %v199_v20, 0.0  ;;  %v110_v29 = vld [vmem:[#allocation2 + $0x2] sm:$0xff]  ;;  %145 = vst.msk [vmem:[#allocation3 + $0x18] sm:$0xff] %vm2332_vm0, %v113_v35  ;;  %1629 = vmatpush3.msra.mxu0 %v473_v45  ;;  %v254_v59 = vld [vmem:[#allocation2 + $0x15] sm:$0xff]  ;;  %vm2335_vm9 = vcmp.lt.s32.totalorder %v1925_v54, 16 }
   0xe   :  { %v111_v28 = vld [vmem:[#allocation2 + $0xa] sm:$0xff]  ;;  %v112_v30 = vld [vmem:[#allocation2 + $0x12] sm:$0xff]  ;;  %v138_v31 = vsel %vm118_vm3, %v110_v29, 0.0  ;;  %v149_v47 = vld [vmem:[#allocation2 + $0x1b] sm:$0xff]  ;;  %1630 = vmatprep.subr.mxu0 %v472_v46  ;;  %vm2341_vm10 = vcmp.lt.s32.totalorder %v1939_v61, 16  ;;  %vm2337_vm11 = vcmp.lt.s32.totalorder %v1950_v12, 16 }
   0xf   :  { %143 = vst.msk [vmem:[#allocation3 + $0x8] sm:$0xff] %vm2332_vm0, %v111_v28  ;;  %v140_v32 = vsel %vm120_vm5, %v112_v30, 0.0  ;;  %v301_v36 = vld [vmem:[#allocation2 + $0x6] sm:$0xff]  ;;  %142 = vst.msk [vmem:[#allocation3] sm:$0xff] %vm2332_vm0, %v138_v31  ;;  %v302_v38 = vld [vmem:[#allocation2 + $0xe] sm:$0xff]  ;;  %1631 = vmatpush3.msra.mxu0 %v472_v46  ;;  %v1964_v19 = vadd.s32 3, %v1927_v55 }
  0x10   :  { %284 = vrot.lane.b32.xlu0 %v252_v16, %s1712_s14  ;;  %144 = vst.msk [vmem:[#allocation3 + $0x10] sm:$0xff] %vm2332_vm0, %v140_v32  ;;  %v330_v41 = vsel %vm2339_vm6, %v302_v38, 0.0  ;;  %v354_v42 = vld [vmem:[#allocation2 + $0x7] sm:$0xff]  ;;  %v201_v43 = vld [vmem:[#allocation2 + $0x14] sm:$0xff]  ;;  %1632 = vmatprep.subr.mxu0 %v471_v51  ;;  %v202_v58 = vld [vmem:[#allocation2 + $0x1c] sm:$0xff]  ;;  %vm349_vm0 = vcmask 654848  }
  0x11   :  { %286 = vrot.lane.b32.xlu1 %v253_v17, %s1712_s14  ;;  %v229_v48 = vsel %vm2333_vm7, %v201_v43, 0.0  ;;  %v355_v49 = vld [vmem:[#allocation2 + $0xf] sm:$0xff]  ;;  %1633 = vmatpush3.msra.mxu0 %v471_v51  ;;  %v255_v0 = vld [vmem:[#allocation2 + $0x1d] sm:$0xff]  ;;  %vm2336_vm12 = vcmp.lt.s32.totalorder %v1964_v19, 16  ;;  %vm402_vm7 = vcmask 786048   ;;  %vm455_vm4 = vcmask 917248  }
  0x12   :  { %v383_v52 = vsel %vm2338_vm8, %v355_v49, 0.0  ;;  %v407_v53 = vld [vmem:[#allocation2 + $0x8] sm:$0xff]  ;;  %1634 = vmatprep.subr.mxu0 %v470_v56  ;;  %v408_v60 = vld [vmem:[#allocation2 + $0x10] sm:$0xff]  ;;  %v304_v8 = vld [vmem:[#allocation2 + $0x1e] sm:$0xff] }
  0x13   :  { %1635 = vmatpush3.msra.mxu0 %v470_v56  ;;  %v436_v63 = vsel %vm2335_vm9, %v408_v60, 0.0  ;;  %v466_v14 = vld [vmem:[%s2320_s1 + $0x10] sm:$0xff]  ;;  %v332_v16 = vsel %vm2341_vm10, %v304_v8, 0.0  ;;  %v357_v17 = vld [vmem:[#allocation2 + $0x1f] sm:$0xff]  ;;  %v465_v20 = vld [vmem:[%s2320_s1 + $0x8] sm:$0xff]  ;;  %vm478_vm9 = vcmask 916480  }
  0x14   :  { %182 = vrot.lane.b32.xlu0 %v174_v23, %s1710_s30  ;;  %1636 = vmatprep.subr.mxu0 %v469_v57  ;;  %v303_v15 = vld [vmem:[#allocation2 + $0x16] sm:$0xff]  ;;  %v410_v26 = vld [vmem:[#allocation2 + $0x20] sm:$0xff] }
  0x15   :  { %235 = vrot.lane.b32.xlu1 %v227_v24, %s1711_s13  ;;  %1637 = vmatpush3.msra.mxu0 %v469_v57  ;;  %v356_v23 = vld [vmem:[#allocation2 + $0x17] sm:$0xff]  ;;  %v385_v24 = vsel %vm2337_vm11, %v357_v17, 0.0  ;;  %v464_v28 = vld [vmem:[%s2320_s1] sm:$0xff]  ;;  %v438_v30 = vsel %vm2336_vm12, %v410_v26, 0.0 }
  0x16   :  { %1638 = vmatprep.subr.mxu0 %v468_v62  ;;  %v409_v29 = vld [vmem:[#allocation2 + $0x18] sm:$0xff] }
  0x17   :  { %1639 = vmatpush3.msra.mxu0 %v468_v62 }
  0x18   :  { %337 = vrot.lane.b32.xlu0 %v301_v36, %s1713_s21  ;;  %1640 = vmatprep.subr.mxu0 %v467_v13 }
  0x19   :  { %186 = vrot.lane.b32.xlu1 %v176_v37, %s1710_s30  ;;  %1641 = vmatpush3.msra.mxu0 %v467_v13  ;;  %v1567_v13 = vld [vmem:[%s2322_s3] ss:$0 sm:$0xff]  ;;  %s1717_s3 = smov 4  }
  0x1a   :  { %1642 = vmatprep.subr.mxu0 %v466_v14 }
  0x1b   :  { %1643 = vmatpush3.msra.mxu0 %v466_v14 }
  0x1c   :  { %339 = vrot.lane.b32.xlu0 %v330_v41, %s1713_s21  ;;  %1644 = vmatprep.subr.mxu0 %v465_v20 }
  0x1d   :  { %390 = vrot.lane.b32.xlu1 %v354_v42, %s1714_s24  ;;  %1645 = vmatpush3.msra.mxu0 %v465_v20 }
  0x1e   :  { %1646 = vmatprep.subr.mxu0 %v464_v28 }
  0x1f   :  { %1647 = vmatpush3.msra.mxu0 %v464_v28 }
  0x20   :  { %188 = vrot.lane.b32.xlu0 %v149_v47, %s1710_s30 }
  0x21   :  { %239 = vrot.lane.b32.xlu1 %v229_v48, %s1711_s13 }
  0x24   :  { %392 = vrot.lane.b32.xlu0 %v383_v52, %s1714_s24 }
  0x25   :  { %443 = vrot.lane.b32.xlu1 %v407_v53, %s1715_s15 }
  0x28   :  { %241 = vrot.lane.b32.xlu0 %v202_v58, %s1711_s13 }
  0x29   :  { %288 = vrot.lane.b32.xlu1 %v254_v59, %s1712_s14 }
  0x2c   :  { %445 = vrot.lane.b32.xlu0 %v436_v63, %s1715_s15 }
  0x2d   :  { %290 = vrot.lane.b32.xlu1 %v255_v0, %s1712_s14  ;;  %v1566_v0 = vld [vmem:[%s2321_s2] ss:$0 sm:$0xff]  ;;  %s1716_s2 = smov 20  }
  0x30   :  { %341 = vrot.lane.b32.xlu0 %v303_v15, %s1713_s21 }
  0x31   :  { %343 = vrot.lane.b32.xlu1 %v332_v16, %s1713_s21 }
  0x34   :  { %394 = vrot.lane.b32.xlu0 %v356_v23, %s1714_s24 }
  0x35   :  { %396 = vrot.lane.b32.xlu1 %v385_v24, %s1714_s24 }
  0x38   :  { %447 = vrot.lane.b32.xlu0 %v409_v29, %s1715_s15 }
  0x39   :  { %449 = vrot.lane.b32.xlu1 %v438_v30, %s1715_s15  ;;  %s1719_s15 = smov 12  }
  0x7e   :  { %v185_v31 = vpop.permute.xlu0 %184 }
  0x7f   :  { %v238_v32 = vpop.permute.xlu1 %237  ;;  %196 = vst.msk [vmem:[#allocation3 + $0x8] sm:$0xff] %vm194_vm13, %v185_v31 }
  0x80   :  { %249 = vst.msk [vmem:[#allocation3 + $0x8] sm:$0xff] %vm247_vm14, %v238_v32  ;;  %v619_v32 = vadd.s32 4294967291, %v1830_v7 }
  0x82   :  { %v285_v33 = vpop.permute.xlu0 %284 }
  0x83   :  { %v287_v34 = vpop.permute.xlu1 %286 }
  0x84   :  { %298 = vst.msk [vmem:[#allocation3 + $0x8] sm:$0xff] %vm296_vm15, %v287_v34 }
  0x86   :  { %v183_v35 = vpop.permute.xlu0 %182 }
  0x87   :  { %v236_v36 = vpop.permute.xlu1 %235  ;;  %195 = vst.msk [vmem:[#allocation3] sm:$0xff] %vm194_vm13, %v183_v35  ;;  %v655_v35 = vadd.s32 4294967292, %v1830_v7 }
  0x88   :  { %248 = vst.msk [vmem:[#allocation3] sm:$0xff] %vm247_vm14, %v236_v36 }
  0x89   :  { %297 = vst.msk [vmem:[#allocation3] sm:$0xff] %vm296_vm15, %v285_v33 }
  0x8a   :  { %v338_v37 = vpop.permute.xlu0 %337 }
  0x8b   :  { %v187_v38 = vpop.permute.xlu1 %186  ;;  %350 = vst.msk [vmem:[#allocation3] sm:$0xff] %vm349_vm0, %v338_v37 }
  0x8c   :  { %197 = vst.msk [vmem:[#allocation3 + $0x10] sm:$0xff] %vm194_vm13, %v187_v38 }
  0x8e   :  { %v340_v40 = vpop.permute.xlu0 %339 }
  0x8f   :  { %v391_v41 = vpop.permute.xlu1 %390  ;;  %351 = vst.msk [vmem:[#allocation3 + $0x8] sm:$0xff] %vm349_vm0, %v340_v40 }
  0x90   :  { %403 = vst.msk [vmem:[#allocation3] sm:$0xff] %vm402_vm7, %v391_v41 }
  0x92   :  { %v189_v42 = vpop.permute.xlu0 %188 }
  0x93   :  { %v240_v43 = vpop.permute.xlu1 %239  ;;  %198 = vst.msk [vmem:[#allocation3 + $0x18] sm:$0xff] %vm194_vm13, %v189_v42 }
  0x94   :  { %250 = vst.msk [vmem:[#allocation3 + $0x10] sm:$0xff] %vm247_vm14, %v240_v43 }
  0x96   :  { %v393_v45 = vpop.permute.xlu0 %392 }
  0x97   :  { %v444_v46 = vpop.permute.xlu1 %443  ;;  %404 = vst.msk [vmem:[#allocation3 + $0x8] sm:$0xff] %vm402_vm7, %v393_v45 }
  0x98   :  { %456 = vst.msk [vmem:[#allocation3] sm:$0xff] %vm455_vm4, %v444_v46 }
  0x9a   :  { %v242_v47 = vpop.permute.xlu0 %241 }
  0x9b   :  { %v289_v48 = vpop.permute.xlu1 %288  ;;  %251 = vst.msk [vmem:[#allocation3 + $0x18] sm:$0xff] %vm247_vm14, %v242_v47  ;;  %vm623_vm14 = vcmp.ge.s32.totalorder %v619_v32, 0  ;;  %v657_v32 = vadd.s32 4294967292, %v1839_v11 }
  0x9c   :  { %299 = vst.msk [vmem:[#allocation3 + $0x10] sm:$0xff] %vm296_vm15, %v289_v48 }
  0x9e   :  { %v446_v49 = vpop.permute.xlu0 %445 }
  0x9f   :  { %v291_v50 = vpop.permute.xlu1 %290  ;;  %v460_v51 = vld [vmem:[#allocation3] sm:$0xff]  ;;  %457 = vst.msk [vmem:[#allocation3 + $0x8] sm:$0xff] %vm455_vm4, %v446_v49 }
  0xa0   :  { %300 = vst.msk [vmem:[#allocation3 + $0x18] sm:$0xff] %vm296_vm15, %v291_v50  ;;  %1648 = vmatprep.mubr.msk.f32.mxu0 %vm478_vm9, %v460_v51 }
  0xa2   :  { %v342_v52 = vpop.permute.xlu0 %341 }
  0xa3   :  { %v344_v53 = vpop.permute.xlu1 %343  ;;  %352 = vst.msk [vmem:[#allocation3 + $0x10] sm:$0xff] %vm349_vm0, %v342_v52 }
  0xa4   :  { %353 = vst.msk [vmem:[#allocation3 + $0x18] sm:$0xff] %vm349_vm0, %v344_v53  ;;  %vm104_vm0 = vcmask 123904  }
  0xa5   :  { %105 = vst.msk [vmem:[#allocation2 + $0x28] sm:$0x3] %vm104_vm0, %v1709_v3  ;;  %vm659_vm0 = vcmp.ge.s32.totalorder %v655_v35, 0 }
  0xa6   :  { %v395_v56 = vpop.permute.xlu0 %394  ;;  %v461_v58 = vld [vmem:[#allocation3 + $0x8] sm:$0xff] }
  0xa7   :  { %v397_v57 = vpop.permute.xlu1 %396  ;;  %405 = vst.msk [vmem:[#allocation3 + $0x10] sm:$0xff] %vm402_vm7, %v395_v56  ;;  %1649 = vmatmul.mubr.msk.f32.vlgmr.msra.gmra.mxu0 %vm478_vm9, %v461_v58 }
  0xa8   :  { %406 = vst.msk [vmem:[#allocation3 + $0x18] sm:$0xff] %vm402_vm7, %v397_v57  ;;  %vm610_vm7 = vcmask 31744   ;;  %v621_v57 = vadd.s32 4294967291, %v1839_v11 }
  0xaa   :  { %v448_v59 = vpop.permute.xlu0 %447 }
  0xab   :  { %v450_v60 = vpop.permute.xlu1 %449  ;;  %458 = vst.msk [vmem:[#allocation3 + $0x10] sm:$0xff] %vm455_vm4, %v448_v59 }
  0xac   :  { %459 = vst.msk [vmem:[#allocation3 + $0x18] sm:$0xff] %vm455_vm4, %v450_v60 }
  0xb2   :  { %v462_v62 = vld [vmem:[#allocation3 + $0x10] sm:$0xff] }
  0xb3   :  { %v463_v63 = vld [vmem:[#allocation3 + $0x18] sm:$0xff]  ;;  %1651 = vmatprep.mubr.msk.f32.mxu0 %vm478_vm9, %v462_v62 }
  0xb4   :  { %1652 = vmatmul.mubr.msk.f32.gmra.mxu0 %vm478_vm9, %v463_v63 }
 0x167   :  { %v1650_v8 = vpop.f32.mrf.mxu0 }
 0x168   :  { %v584_v14 = vmul.f32 %v1650_v8, %v1566_v0 }
 0x169   :  { %v557_v15 = vpop.f32.mrf.mxu0 }
 0x16a   :  { %v595_v16 = vadd.f32 %v1567_v13, %v584_v14  ;;  %v583_v17 = vmul.f32 %v1566_v0, %v557_v15 }
 0x16c   :  { %vm599_vm4 = vcmp.gt.f32.partialorder %v595_v16, 0.0  ;;  %v603_v20 = vmul.f32 0.01, %v595_v16  ;;  %v594_v23 = vadd.f32 %v1567_v13, %v583_v17 }
 0x16e   :  { %v607_v24 = vsel %vm599_vm4, %v595_v16, %v603_v20  ;;  %vm598_vm9 = vcmp.gt.f32.partialorder %v594_v23, 0.0  ;;  %v602_v3 = vmul.f32 0.01, %v594_v23  ;;  %vm625_vm4 = vcmp.ge.s32.totalorder %v621_v57, 0 }
 0x16f   :  { %612 = vst.msk [vmem:[#allocation2 + $0xd] sm:$0xff] %vm610_vm7, %v607_v24 }
 0x170   :  { %v606_v26 = vsel %vm598_vm9, %v594_v23, %v602_v3  ;;  %vm661_vm9 = vcmp.ge.s32.totalorder %v657_v32, 0 }
 0x171   :  { %611 = vst.msk [vmem:[#allocation2 + $0x5] sm:$0xff] %vm610_vm7, %v606_v26 }
 0x174   :  { %v1653_v28 = vpop.f32.mrf.mxu0 }
 0x175   :  { %v586_v29 = vmul.f32 %v1653_v28, %v1566_v0 }
 0x176   :  { %v567_v30 = vpop.f32.mrf.mxu0  ;;  %v792_v31 = vld [vmem:[#allocation2 + $0xd] sm:$0xff] }
 0x177   :  { %v597_v33 = vadd.f32 %v1567_v13, %v586_v29  ;;  %v585_v34 = vmul.f32 %v1566_v0, %v567_v30  ;;  %805 = vrot.lane.b32.xlu0 %v792_v31, %s1716_s2 }
 0x178   :  { %v652_v36 = vld [vmem:[#allocation2 + $0x9] sm:$0xff]  ;;  %v651_v43 = vld [vmem:[#allocation2 + $0x1] sm:$0xff] }
 0x179   :  { %vm601_vm13 = vcmp.gt.f32.partialorder %v597_v33, 0.0  ;;  %v605_v37 = vmul.f32 0.01, %v597_v33  ;;  %v596_v38 = vadd.f32 %v1567_v13, %v585_v34  ;;  %689 = vrot.lane.b32.xlu1 %v652_v36, %s1717_s3  ;;  %v763_v40 = vld [vmem:[#allocation2 + $0xc] sm:$0xff]  ;;  %v615_v46 = vld [vmem:[#allocation2] sm:$0xff]  ;;  %v679_v49 = vsel %vm659_vm0, %v651_v43, 0.0 }
 0x17a   :  { %v705_v45 = vld [vmem:[#allocation2 + $0xa] sm:$0xff]  ;;  %v643_v48 = vsel %vm623_vm14, %v615_v46, 0.0  ;;  %v704_v50 = vld [vmem:[#allocation2 + $0x2] sm:$0xff]  ;;  %v1020_v46 = vld [vmem:[%s2323_s4 + $0x18] sm:$0xff]  ;;  %vm2342_vm14 = vcmp.lt.s32.totalorder %v1925_v54, 16  ;;  %vm2343_vm0 = vcmp.ge.s32.totalorder %v1853_v21, 0 }
 0x17b   :  { %v609_v41 = vsel %vm601_vm13, %v597_v33, %v605_v37  ;;  %vm600_vm15 = vcmp.gt.f32.partialorder %v596_v38, 0.0  ;;  %v604_v42 = vmul.f32 0.01, %v596_v38  ;;  %776 = vrot.lane.b32.xlu0 %v763_v40, %s1710_s30  ;;  %v878_v7 = vld [vmem:[#allocation2 + $0x8] sm:$0xff]  ;;  %647 = vst.msk [vmem:[#allocation4] sm:$0xff] %vm610_vm7, %v643_v48  ;;  %v708_v52 = vsel %vm118_vm3, %v704_v50, 0.0 }
 0x17c   :  { %614 = vst.msk [vmem:[#allocation2 + $0x1d] sm:$0xff] %vm610_vm7, %v609_v41  ;;  %648 = vst.msk [vmem:[#allocation4 + $0x8] sm:$0xff] %vm610_vm7, %v878_v7  ;;  %v734_v51 = vld [vmem:[#allocation2 + $0xb] sm:$0xff]  ;;  %v733_v53 = vld [vmem:[#allocation2 + $0x3] sm:$0xff]  ;;  %vm2340_vm13 = vcmask 1043456  }
 0x17d   :  { %v608_v47 = vsel %vm600_vm15, %v596_v38, %v604_v42  ;;  %718 = vrot.lane.b32.xlu1 %v705_v45, %s1718_s29  ;;  %v791_v56 = vld [vmem:[#allocation2 + $0x5] sm:$0xff]  ;;  %v737_v58 = vsel %vm154_vm1, %v733_v53, 0.0  ;;  %v912_v42 = vadd.s32 4, %v1855_v22  ;;  %v914_v53 = vadd.s32 4, %v1927_v55 }
 0x17e   :  { %613 = vst.msk [vmem:[#allocation2 + $0x15] sm:$0xff] %vm610_vm7, %v608_v47  ;;  %v762_v60 = vld [vmem:[#allocation2 + $0x4] sm:$0xff]  ;;  %v1019_v47 = vld [vmem:[%s2323_s4 + $0x10] sm:$0xff] }
 0x17f   :  { %687 = vrot.lane.b32.xlu0 %v679_v49, %s1717_s3  ;;  %v820_v62 = vld [vmem:[#allocation2 + $0x6] sm:$0xff]  ;;  %v766_v0 = vsel %vm207_vm2, %v762_v60, 0.0  ;;  %vm920_vm15 = vcmp.lt.s32.totalorder %v912_v42, 16  ;;  %v965_v49 = vadd.s32 5, %v1855_v22 }
 0x180   :  { %v849_v13 = vld [vmem:[#allocation2 + $0x7] sm:$0xff] }
 0x181   :  { %747 = vrot.lane.b32.xlu1 %v734_v51, %s1719_s15  ;;  %v1022_v38 = vld [vmem:[%s2323_s4 + $0x28] sm:$0xf]  ;;  %v1021_v43 = vld [vmem:[%s2323_s4 + $0x20] sm:$0xff] }
 0x182   :  { %1654 = vmatprep.subr.msk.mxu1 %vm2340_vm13, %v1022_v38  ;;  %v1018_v50 = vld [vmem:[%s2323_s4 + $0x8] sm:$0xff] }
 0x183   :  { %716 = vrot.lane.b32.xlu0 %v708_v52, %s1718_s29  ;;  %v794_v14 = vld [vmem:[#allocation2 + $0x1d] sm:$0xff]  ;;  %1655 = vmatpush3.msk.msra.mxu1 %vm2340_vm13, %v1022_v38  ;;  %vm1008_vm13 = vcmask 359744  }
 0x184   :  { %v823_v15 = vld [vmem:[#allocation2 + $0x1e] sm:$0xff]  ;;  %1656 = vmatprep.subr.mxu1 %v1021_v43 }
 0x185   :  { %803 = vrot.lane.b32.xlu1 %v791_v56, %s1716_s2  ;;  %v880_v59 = vld [vmem:[#allocation2 + $0x18] sm:$0xff]  ;;  %v2042_v63 = vld [vmem:[#allocation2 + $0x10] sm:$0xff]  ;;  %v827_v16 = vsel %vm2341_vm10, %v823_v15, 0.0  ;;  %v881_v3 = vld [vmem:[#allocation2 + $0x20] sm:$0xff]  ;;  %1657 = vmatpush3.msra.mxu1 %v1021_v43  ;;  %vm1023_vm10 = vcmask 359424  }
 0x186   :  { %650 = vst.msk [vmem:[#allocation4 + $0x18] sm:$0xff] %vm610_vm7, %v880_v59  ;;  %v645_v8 = vsel %vm625_vm4, %v2042_v63, 0.0  ;;  %v654_v17 = vld [vmem:[#allocation2 + $0x19] sm:$0xff]  ;;  %v885_v28 = vsel %vm2336_vm12, %v881_v3, 0.0  ;;  %v821_v33 = vld [vmem:[#allocation2 + $0xe] sm:$0xff]  ;;  %v883_v48 = vsel %vm2342_vm14, %v2042_v63, 0.0  ;;  %1658 = vmatprep.subr.mxu1 %v1020_v46 }
 0x187   :  { %745 = vrot.lane.b32.xlu0 %v737_v58, %s1719_s15  ;;  %649 = vst.msk [vmem:[#allocation4 + $0x10] sm:$0xff] %vm610_vm7, %v645_v8  ;;  %v852_v20 = vld [vmem:[#allocation2 + $0x1f] sm:$0xff]  ;;  %v793_v30 = vld [vmem:[#allocation2 + $0x15] sm:$0xff]  ;;  %1659 = vmatpush3.msra.mxu1 %v1020_v46  ;;  %vm973_vm4 = vcmp.lt.s32.totalorder %v965_v49, 16  ;;  %vm922_vm14 = vcmp.lt.s32.totalorder %v914_v53, 16  ;;  %vm815_vm12 = vcmask 195744  }
 0x188   :  { %v2058_v23 = vld [vmem:[#allocation2 + $0x1a] sm:$0xff]  ;;  %v856_v24 = vsel %vm2337_vm11, %v852_v20, 0.0  ;;  %v653_v35 = vld [vmem:[#allocation2 + $0x11] sm:$0xff]  ;;  %1660 = vmatprep.subr.mxu1 %v1019_v47  ;;  %v963_v63 = vld [vmem:[#allocation2 + $0x22] sm:$0xff]  ;;  %vm873_vm11 = vcmask 261344  }
 0x189   :  { %832 = vrot.lane.b32.xlu1 %v820_v62, %s1720_s16  ;;  %v736_v26 = vld [vmem:[#allocation2 + $0x1b] sm:$0xff]  ;;  %v850_v37 = vld [vmem:[#allocation2 + $0xf] sm:$0xff]  ;;  %v681_v11 = vsel %vm661_vm9, %v653_v35, 0.0  ;;  %1661 = vmatpush3.msra.mxu1 %v1019_v47  ;;  %v936_v22 = vsel %vm920_vm15, %v653_v35, 0.0  ;;  %vm2344_vm9 = vcmp.ge.s32.totalorder %v1892_v39, 0 }
 0x18a   :  { %v765_v29 = vld [vmem:[#allocation2 + $0x1c] sm:$0xff]  ;;  %v706_v40 = vld [vmem:[#allocation2 + $0x12] sm:$0xff]  ;;  %v854_v41 = vsel %vm2338_vm8, %v850_v37, 0.0  ;;  %1662 = vmatprep.subr.mxu1 %v1018_v50  ;;  %vm902_vm8 = vcmask 294144  }
 0x18b   :  { %774 = vrot.lane.b32.xlu0 %v766_v0, %s1710_s30  ;;  %v822_v31 = vld [vmem:[#allocation2 + $0x16] sm:$0xff]  ;;  %v1017_v56 = vld [vmem:[%s2323_s4] sm:$0xff]  ;;  %1663 = vmatpush3.msra.mxu1 %v1018_v50  ;;  %v989_v60 = vsel %vm973_vm4, %v706_v40, 0.0  ;;  %vm728_vm4 = vcmask 97344  }
 0x18c   :  { %v851_v34 = vld [vmem:[#allocation2 + $0x17] sm:$0xff]  ;;  %1664 = vmatprep.subr.mxu1 %v1017_v56  ;;  %v910_v58 = vld [vmem:[#allocation2 + $0x21] sm:$0xff] }
 0x18d   :  { %861 = vrot.lane.b32.xlu1 %v849_v13, %s1721_s17  ;;  %v764_v52 = vld [vmem:[#allocation2 + $0x14] sm:$0xff]  ;;  %1665 = vmatpush3.msra.mxu1 %v1017_v56  ;;  %v938_v62 = vsel %vm922_vm14, %v910_v58, 0.0  ;;  %vm786_vm14 = vcmask 162944  }
 0x18e   :  { %v768_v57 = vsel %vm2344_vm9, %v764_v52, 0.0  ;;  %vm757_vm9 = vcmask 130144  }
 0x18f   :  { %809 = vrot.lane.b32.xlu0 %v794_v14, %s1716_s2 }
 0x191   :  { %890 = vrot.lane.b32.xlu1 %v878_v7, %s1711_s13  ;;  %v735_v7 = vld [vmem:[#allocation2 + $0x13] sm:$0xff] }
 0x192   :  { %v739_v51 = vsel %vm2343_vm0, %v735_v7, 0.0  ;;  %vm699_vm0 = vcmask 64544  }
 0x193   :  { %838 = vrot.lane.b32.xlu0 %v827_v16, %s1720_s16 }
 0x195   :  { %943 = vrot.lane.b32.xlu1 %v652_v36, %s1722_s18  ;;  %v825_v36 = vsel %vm2339_vm6, %v821_v33, 0.0  ;;  %vm955_vm6 = vcmask 326944  }
 0x197   :  { %693 = vrot.lane.b32.xlu0 %v654_v17, %s1717_s3 }
 0x199   :  { %996 = vrot.lane.b32.xlu1 %v705_v45, %s1723_s19  ;;  %v710_v45 = vsel %vm120_vm5, %v706_v40, 0.0 }
 0x19b   :  { %722 = vrot.lane.b32.xlu0 %v2058_v23, %s1718_s29 }
 0x19d   :  { %867 = vrot.lane.b32.xlu1 %v856_v24, %s1721_s17 }
 0x19f   :  { %751 = vrot.lane.b32.xlu0 %v736_v26, %s1719_s15 }
 0x1a1   :  { %896 = vrot.lane.b32.xlu1 %v885_v28, %s1711_s13 }
 0x1a3   :  { %780 = vrot.lane.b32.xlu0 %v765_v29, %s1710_s30 }
 0x1a5   :  { %807 = vrot.lane.b32.xlu1 %v793_v30, %s1716_s2 }
 0x1a7   :  { %894 = vrot.lane.b32.xlu0 %v880_v59, %s1711_s13  ;;  %v967_v59 = vadd.s32 5, %v1927_v55 }
 0x1a9   :  { %836 = vrot.lane.b32.xlu1 %v822_v31, %s1720_s16  ;;  %vm975_vm15 = vcmp.lt.s32.totalorder %v967_v59, 16 }
 0x1aa   :  { %v991_v0 = vsel %vm975_vm15, %v963_v63, 0.0  ;;  %vm844_vm15 = vcmask 228544  }
 0x1ab   :  { %947 = vrot.lane.b32.xlu0 %v654_v17, %s1722_s18 }
 0x1ad   :  { %865 = vrot.lane.b32.xlu1 %v851_v34, %s1721_s17 }
 0x1af   :  { %834 = vrot.lane.b32.xlu0 %v825_v36, %s1720_s16 }
 0x1b1   :  { %691 = vrot.lane.b32.xlu1 %v681_v11, %s1717_s3 }
 0x1b3   :  { %863 = vrot.lane.b32.xlu0 %v854_v41, %s1721_s17 }
 0x1b5   :  { %720 = vrot.lane.b32.xlu1 %v710_v45, %s1718_s29 }
 0x1b7   :  { %892 = vrot.lane.b32.xlu0 %v883_v48, %s1711_s13 }
 0x1b9   :  { %749 = vrot.lane.b32.xlu1 %v739_v51, %s1719_s15 }
 0x1bb   :  { %945 = vrot.lane.b32.xlu0 %v936_v22, %s1722_s18 }
 0x1bd   :  { %778 = vrot.lane.b32.xlu1 %v768_v57, %s1710_s30 }
 0x1bf   :  { %998 = vrot.lane.b32.xlu0 %v989_v60, %s1723_s19 }
 0x1c1   :  { %949 = vrot.lane.b32.xlu1 %v938_v62, %s1722_s18  ;;  %v1573_v62 = vld [vmem:[%s2324_s5] ss:$0 sm:$0xff] }
 0x1c3   :  { %1000 = vrot.lane.b32.xlu0 %v2058_v23, %s1723_s19 }
 0x1c5   :  { %1002 = vrot.lane.b32.xlu1 %v991_v0, %s1723_s19  ;;  %v1574_v0 = vld [vmem:[%s2325_s6] ss:$0 sm:$0xff] }
 0x1e9   :  { %v806_v8 = vpop.permute.xlu0 %805 }
 0x1eb   :  { %v690_v13 = vpop.permute.xlu1 %689 }
 0x1ec   :  { %701 = vst.msk [vmem:[#allocation4 + $0x8] sm:$0xff] %vm699_vm0, %v690_v13 }
 0x1ed   :  { %v777_v55 = vpop.permute.xlu0 %776 }
 0x1ef   :  { %v719_v14 = vpop.permute.xlu1 %718 }
 0x1f0   :  { %730 = vst.msk [vmem:[#allocation4 + $0x8] sm:$0xff] %vm728_vm4, %v719_v14 }
 0x1f1   :  { %v688_v15 = vpop.permute.xlu0 %687 }
 0x1f2   :  { %700 = vst.msk [vmem:[#allocation4] sm:$0xff] %vm699_vm0, %v688_v15 }
 0x1f3   :  { %v748_v16 = vpop.permute.xlu1 %747 }
 0x1f4   :  { %759 = vst.msk [vmem:[#allocation4 + $0x8] sm:$0xff] %vm757_vm9, %v748_v16 }
 0x1f5   :  { %788 = vst.msk [vmem:[#allocation4 + $0x8] sm:$0xff] %vm786_vm14, %v777_v55  ;;  %v717_v17 = vpop.permute.xlu0 %716 }
 0x1f6   :  { %729 = vst.msk [vmem:[#allocation4] sm:$0xff] %vm728_vm4, %v717_v17 }
 0x1f7   :  { %817 = vst.msk [vmem:[#allocation4 + $0x8] sm:$0xff] %vm815_vm12, %v806_v8  ;;  %v804_v20 = vpop.permute.xlu1 %803 }
 0x1f9   :  { %v746_v23 = vpop.permute.xlu0 %745 }
 0x1fa   :  { %758 = vst.msk [vmem:[#allocation4] sm:$0xff] %vm757_vm9, %v746_v23 }
 0x1fb   :  { %v833_v24 = vpop.permute.xlu1 %832 }
 0x1fd   :  { %v775_v3 = vpop.permute.xlu0 %774 }
 0x1fe   :  { %787 = vst.msk [vmem:[#allocation4] sm:$0xff] %vm786_vm14, %v775_v3 }
 0x1ff   :  { %816 = vst.msk [vmem:[#allocation4] sm:$0xff] %vm815_vm12, %v804_v20  ;;  %v862_v26 = vpop.permute.xlu1 %861 }
 0x200   :  { %845 = vst.msk [vmem:[#allocation4] sm:$0xff] %vm844_vm15, %v833_v24 }
 0x201   :  { %874 = vst.msk [vmem:[#allocation4] sm:$0xff] %vm873_vm11, %v862_v26  ;;  %v810_v28 = vpop.permute.xlu0 %809 }
 0x203   :  { %v891_v29 = vpop.permute.xlu1 %890 }
 0x204   :  { %903 = vst.msk [vmem:[#allocation4] sm:$0xff] %vm902_vm8, %v891_v29 }
 0x205   :  { %v839_v30 = vpop.permute.xlu0 %838 }
 0x207   :  { %v944_v31 = vpop.permute.xlu1 %943 }
 0x208   :  { %956 = vst.msk [vmem:[#allocation4] sm:$0xff] %vm955_vm6, %v944_v31 }
 0x209   :  { %v694_v32 = vpop.permute.xlu0 %693 }
 0x20a   :  { %703 = vst.msk [vmem:[#allocation4 + $0x18] sm:$0xff] %vm699_vm0, %v694_v32 }
 0x20b   :  { %v997_v33 = vpop.permute.xlu1 %996 }
 0x20c   :  { %1009 = vst.msk [vmem:[#allocation4] sm:$0xff] %vm1008_vm13, %v997_v33 }
 0x20d   :  { %v723_v34 = vpop.permute.xlu0 %722 }
 0x20e   :  { %732 = vst.msk [vmem:[#allocation4 + $0x18] sm:$0xff] %vm728_vm4, %v723_v34 }
 0x20f   :  { %v868_v35 = vpop.permute.xlu1 %867 }
 0x211   :  { %v752_v36 = vpop.permute.xlu0 %751 }
 0x212   :  { %761 = vst.msk [vmem:[#allocation4 + $0x18] sm:$0xff] %vm757_vm9, %v752_v36 }
 0x213   :  { %v897_v37 = vpop.permute.xlu1 %896  ;;  %v1013_v38 = vld [vmem:[#allocation4] sm:$0xff] }
 0x214   :  { %1666 = vmatprep.mubr.msk.f32.mxu1 %vm1023_vm10, %v1013_v38 }
 0x215   :  { %v781_v11 = vpop.permute.xlu0 %780 }
 0x216   :  { %790 = vst.msk [vmem:[#allocation4 + $0x18] sm:$0xff] %vm786_vm14, %v781_v11 }
 0x217   :  { %819 = vst.msk [vmem:[#allocation4 + $0x18] sm:$0xff] %vm815_vm12, %v810_v28  ;;  %v808_v40 = vpop.permute.xlu1 %807 }
 0x218   :  { %848 = vst.msk [vmem:[#allocation4 + $0x18] sm:$0xff] %vm844_vm15, %v839_v30 }
 0x219   :  { %877 = vst.msk [vmem:[#allocation4 + $0x18] sm:$0xff] %vm873_vm11, %v868_v35  ;;  %v895_v41 = vpop.permute.xlu0 %894 }
 0x21a   :  { %906 = vst.msk [vmem:[#allocation4 + $0x18] sm:$0xff] %vm902_vm8, %v897_v37 }
 0x21b   :  { %v837_v42 = vpop.permute.xlu1 %836 }
 0x21d   :  { %v948_v43 = vpop.permute.xlu0 %947 }
 0x21f   :  { %v866_v45 = vpop.permute.xlu1 %865 }
 0x221   :  { %v835_v7 = vpop.permute.xlu0 %834 }
 0x222   :  { %846 = vst.msk [vmem:[#allocation4 + $0x8] sm:$0xff] %vm844_vm15, %v835_v7 }
 0x223   :  { %v692_v46 = vpop.permute.xlu1 %691 }
 0x224   :  { %702 = vst.msk [vmem:[#allocation4 + $0x10] sm:$0xff] %vm699_vm0, %v692_v46 }
 0x225   :  { %v864_v47 = vpop.permute.xlu0 %863 }
 0x226   :  { %875 = vst.msk [vmem:[#allocation4 + $0x8] sm:$0xff] %vm873_vm11, %v864_v47 }
 0x227   :  { %v721_v48 = vpop.permute.xlu1 %720 }
 0x228   :  { %731 = vst.msk [vmem:[#allocation4 + $0x10] sm:$0xff] %vm728_vm4, %v721_v48 }
 0x229   :  { %v893_v49 = vpop.permute.xlu0 %892 }
 0x22a   :  { %904 = vst.msk [vmem:[#allocation4 + $0x8] sm:$0xff] %vm902_vm8, %v893_v49 }
 0x22b   :  { %v750_v50 = vpop.permute.xlu1 %749 }
 0x22c   :  { %760 = vst.msk [vmem:[#allocation4 + $0x10] sm:$0xff] %vm757_vm9, %v750_v50 }
 0x22d   :  { %v946_v51 = vpop.permute.xlu0 %945 }
 0x22e   :  { %957 = vst.msk [vmem:[#allocation4 + $0x8] sm:$0xff] %vm955_vm6, %v946_v51 }
 0x22f   :  { %v779_v52 = vpop.permute.xlu1 %778 }
 0x230   :  { %789 = vst.msk [vmem:[#allocation4 + $0x10] sm:$0xff] %vm786_vm14, %v779_v52 }
 0x231   :  { %818 = vst.msk [vmem:[#allocation4 + $0x10] sm:$0xff] %vm815_vm12, %v808_v40  ;;  %v999_v53 = vpop.permute.xlu0 %998 }
 0x232   :  { %847 = vst.msk [vmem:[#allocation4 + $0x10] sm:$0xff] %vm844_vm15, %v837_v42 }
 0x233   :  { %1010 = vst.msk [vmem:[#allocation4 + $0x8] sm:$0xff] %vm1008_vm13, %v999_v53  ;;  %v950_v56 = vpop.permute.xlu1 %949 }
 0x234   :  { %876 = vst.msk [vmem:[#allocation4 + $0x10] sm:$0xff] %vm873_vm11, %v866_v45 }
 0x235   :  { %905 = vst.msk [vmem:[#allocation4 + $0x10] sm:$0xff] %vm902_vm8, %v895_v41  ;;  %v1001_v22 = vpop.permute.xlu0 %1000 }
 0x236   :  { %959 = vst.msk [vmem:[#allocation4 + $0x18] sm:$0xff] %vm955_vm6, %v950_v56  ;;  %958 = vst.msk [vmem:[#allocation4 + $0x10] sm:$0xff] %vm955_vm6, %v948_v43 }
 0x237   :  { %1011 = vst.msk [vmem:[#allocation4 + $0x10] sm:$0xff] %vm1008_vm13, %v1001_v22  ;;  %v1003_v57 = vpop.permute.xlu1 %1002 }
 0x238   :  { %1012 = vst.msk [vmem:[#allocation4 + $0x18] sm:$0xff] %vm1008_vm13, %v1003_v57  ;;  %vm2350_vm13 = vcmp.ge.s32.totalorder %v1892_v39, 0 }
 0x23a   :  { %v1014_v58 = vld [vmem:[#allocation4 + $0x8] sm:$0xff] }
 0x23b   :  { %1667 = vmatmul.mubr.msk.f32.vlgmr.msra.gmra.mxu1 %vm1023_vm10, %v1014_v58 }
 0x23e   :  { %v1015_v59 = vld [vmem:[#allocation4 + $0x10] sm:$0xff] }
 0x23f   :  { %1669 = vmatprep.mubr.msk.f32.mxu1 %vm1023_vm10, %v1015_v59  ;;  %v1016_v60 = vld [vmem:[#allocation4 + $0x18] sm:$0xff]  ;;  %v1350_v59 = vld [vmem:[%s2326_s7 + $0x18] sm:$0xf] }
 0x240   :  { %1670 = vmatmul.mubr.msk.f32.gmra.mxu1 %vm1023_vm10, %v1016_v60  ;;  %v1349_v60 = vld [vmem:[%s2326_s7 + $0x10] sm:$0xff] }
 0x2fb   :  { %v1668_v63 = vpop.f32.mrf.mxu1 }
 0x2fc   :  { %v1133_v8 = vmul.f32 %v1668_v63, %v1573_v62 }
 0x2fd   :  { %v1106_v13 = vpop.f32.mrf.mxu1 }
 0x2fe   :  { %v1144_v55 = vadd.f32 %v1574_v0, %v1133_v8  ;;  %v1132_v14 = vmul.f32 %v1573_v62, %v1106_v13  ;;  %v1347_v8 = vld [vmem:[%s2326_s7] sm:$0xff] }
 0x300   :  { %vm1148_vm6 = vcmp.gt.f32.partialorder %v1144_v55, 0.0  ;;  %v1152_v15 = vmul.f32 0.01, %v1144_v55  ;;  %v1143_v16 = vadd.f32 %v1574_v0, %v1132_v14  ;;  %v1671_v17 = vpop.f32.mrf.mxu1 }
 0x301   :  { %v1135_v24 = vmul.f32 %v1671_v17, %v1573_v62 }
 0x302   :  { %v1156_v20 = vsel %vm1148_vm6, %v1144_v55, %v1152_v15  ;;  %vm1147_vm8 = vcmp.gt.f32.partialorder %v1143_v16, 0.0  ;;  %v1151_v23 = vmul.f32 0.01, %v1143_v16  ;;  %v1116_v3 = vpop.f32.mrf.mxu1  ;;  %vm2351_vm6 = vcmp.lt.s32.totalorder %v1903_v44, 16 }
 0x303   :  { %1160 = vst.msk [vmem:[#allocation2 + $0xd] sm:$0xff] %vm610_vm7, %v1156_v20  ;;  %v1146_v28 = vadd.f32 %v1574_v0, %v1135_v24  ;;  %v1134_v29 = vmul.f32 %v1573_v62, %v1116_v3 }
 0x304   :  { %v1155_v26 = vsel %vm1147_vm8, %v1143_v16, %v1151_v23  ;;  %vm2352_vm8 = vcmp.lt.s32.totalorder %v1950_v12, 16 }
 0x305   :  { %1159 = vst.msk [vmem:[#allocation2 + $0x5] sm:$0xff] %vm610_vm7, %v1155_v26  ;;  %vm1150_vm10 = vcmp.gt.f32.partialorder %v1146_v28, 0.0  ;;  %v1154_v30 = vmul.f32 0.01, %v1146_v28  ;;  %v1145_v31 = vadd.f32 %v1574_v0, %v1134_v29 }
 0x307   :  { %v1158_v32 = vsel %vm1150_vm10, %v1146_v28, %v1154_v30  ;;  %vm1149_vm11 = vcmp.gt.f32.partialorder %v1145_v31, 0.0  ;;  %v1153_v33 = vmul.f32 0.01, %v1145_v31  ;;  %vm2353_vm10 = vcmp.lt.s32.totalorder %v1925_v54, 16 }
 0x308   :  { %1162 = vst.msk [vmem:[#allocation2 + $0x1d] sm:$0xff] %vm610_vm7, %v1158_v32 }
 0x309   :  { %v1157_v34 = vsel %vm1149_vm11, %v1145_v31, %v1153_v33  ;;  %vm2354_vm11 = vcmp.lt.s32.totalorder %v1964_v19, 16 }
 0x30a   :  { %v1232_v35 = vld [vmem:[#allocation2 + $0xd] sm:$0xff]  ;;  %1161 = vst.msk [vmem:[#allocation2 + $0x15] sm:$0xff] %vm610_vm7, %v1157_v34 }
 0x30b   :  { %1245 = vrot.lane.b32.xlu1 %v1232_v35, %s1719_s15 }
 0x30c   :  { %v1231_v36 = vld [vmem:[#allocation2 + $0x5] sm:$0xff] }
 0x30d   :  { %1243 = vrot.lane.b32.xlu0 %v1231_v36, %s1719_s15  ;;  %v1176_v37 = vld [vmem:[#allocation2 + $0xb] sm:$0xff]  ;;  %v1163_v11 = vld [vmem:[#allocation2 + $0x2] sm:$0xff] }
 0x30e   :  { %v1164_v38 = vld [vmem:[#allocation2 + $0xa] sm:$0xff]  ;;  %v1167_v41 = vsel %vm118_vm3, %v1163_v11, 0.0  ;;  %vm2347_vm3 = vcmask 1043456  }
 0x30f   :  { %1189 = vrot.lane.b32.xlu1 %v1176_v37, %s1717_s3  ;;  %1172 = vst.msk [vmem:[#allocation5 + $0x8] sm:$0xff] %vm610_vm7, %v1164_v38  ;;  %v1259_v40 = vld [vmem:[#allocation2 + $0x6] sm:$0xff]  ;;  %1171 = vst.msk [vmem:[#allocation5] sm:$0xff] %vm610_vm7, %v1167_v41  ;;  %v1234_v51 = vld [vmem:[#allocation2 + $0x1d] sm:$0xff]  ;;  %1672 = vmatprep.subr.msk.mxu1 %vm2347_vm3, %v1350_v59 }
 0x310   :  { %v1175_v42 = vld [vmem:[#allocation2 + $0x3] sm:$0xff]  ;;  %v1204_v43 = vld [vmem:[#allocation2 + $0xc] sm:$0xff] }
 0x311   :  { %1271 = vrot.lane.b32.xlu0 %v1259_v40, %s1710_s30  ;;  %v1179_v45 = vsel %vm154_vm1, %v1175_v42, 0.0  ;;  %v1203_v7 = vld [vmem:[#allocation2 + $0x4] sm:$0xff]  ;;  %v1166_v46 = vld [vmem:[#allocation2 + $0x1a] sm:$0xff]  ;;  %v1165_v18 = vld [vmem:[#allocation2 + $0x12] sm:$0xff]  ;;  %vm2345_vm1 = vcmp.lt.s32.totalorder %v1939_v61, 16 }
 0x312   :  { %v1287_v47 = vld [vmem:[#allocation2 + $0x7] sm:$0xff]  ;;  %1174 = vst.msk [vmem:[#allocation5 + $0x18] sm:$0xff] %vm610_vm7, %v1166_v46  ;;  %v1169_v48 = vsel %vm120_vm5, %v1165_v18, 0.0  ;;  %v1207_v49 = vsel %vm207_vm2, %v1203_v7, 0.0  ;;  %v1178_v50 = vld [vmem:[#allocation2 + $0x1b] sm:$0xff]  ;;  %v1177_v22 = vld [vmem:[#allocation2 + $0x13] sm:$0xff] }
 0x313   :  { %1217 = vrot.lane.b32.xlu1 %v1204_v43, %s1718_s29  ;;  %1173 = vst.msk [vmem:[#allocation5 + $0x10] sm:$0xff] %vm610_vm7, %v1169_v48  ;;  %v1315_v9 = vld [vmem:[#allocation2 + $0x8] sm:$0xff]  ;;  %v1262_v52 = vld [vmem:[#allocation2 + $0x1e] sm:$0xff]  ;;  %v1261_v25 = vld [vmem:[#allocation2 + $0x16] sm:$0xff]  ;;  %vm2346_vm2 = vcmp.ge.s32.totalorder %v1853_v21, 0  ;;  %vm2349_vm7 = vcmp.lt.s32.totalorder %v1869_v27, 16 }
 0x314   :  { %v1206_v53 = vld [vmem:[#allocation2 + $0x1c] sm:$0xff]  ;;  %v1266_v10 = vsel %vm2345_vm1, %v1262_v52, 0.0  ;;  %v1260_v58 = vld [vmem:[#allocation2 + $0xe] sm:$0xff]  ;;  %v1181_v61 = vsel %vm2346_vm2, %v1177_v22, 0.0  ;;  %vm2348_vm5 = vmmov %vm2347_vm3  ;;  %vm1351_vm1 = vcmask 228352  }
 0x315   :  { %1187 = vrot.lane.b32.xlu0 %v1179_v45, %s1717_s3  ;;  %v1233_v56 = vld [vmem:[#allocation2 + $0x15] sm:$0xff]  ;;  %1673 = vmatpush3.msk.msra.mxu1 %vm2348_vm5, %v1350_v59  ;;  %v1264_v63 = vsel %vm2349_vm7, %v1260_v58, 0.0  ;;  %v1348_v21 = vld [vmem:[%s2326_s7 + $0x8] sm:$0xff]  ;;  %v1290_v27 = vld [vmem:[#allocation2 + $0x1f] sm:$0xff] }
 0x316   :  { %v1289_v57 = vld [vmem:[#allocation2 + $0x17] sm:$0xff]  ;;  %1674 = vmatprep.subr.mxu1 %v1349_v60  ;;  %v1288_v0 = vld [vmem:[#allocation2 + $0xf] sm:$0xff]  ;;  %v1294_v15 = vsel %vm2352_vm8, %v1290_v27, 0.0  ;;  %v1318_v39 = vld [vmem:[#allocation2 + $0x20] sm:$0xff] }
 0x317   :  { %1299 = vrot.lane.b32.xlu1 %v1287_v47, %s1716_s2  ;;  %v1205_v62 = vld [vmem:[#allocation2 + $0x14] sm:$0xff]  ;;  %1675 = vmatpush3.msra.mxu1 %v1349_v60  ;;  %v1292_v55 = vsel %vm2351_vm6, %v1288_v0, 0.0  ;;  %v1322_v44 = vsel %vm2354_vm11, %v1318_v39, 0.0  ;;  %v1580_v18 = vld [vmem:[%s2327_s8] ss:$0 sm:$0xff] }
 0x318   :  { %v1209_v13 = vsel %vm2350_vm13, %v1205_v62, 0.0  ;;  %1676 = vmatprep.subr.mxu1 %v1348_v21  ;;  %v1316_v14 = vld [vmem:[#allocation2 + $0x10] sm:$0xff]  ;;  %v1317_v17 = vld [vmem:[#allocation2 + $0x18] sm:$0xff] }
 0x319   :  { %1215 = vrot.lane.b32.xlu0 %v1207_v49, %s1718_s29  ;;  %1677 = vmatpush3.msra.mxu1 %v1348_v21  ;;  %v1320_v16 = vsel %vm2353_vm10, %v1316_v14, 0.0  ;;  %v1581_v49 = vld [vmem:[%s2328_s9] ss:$0 sm:$0xff] }
 0x31a   :  { %1678 = vmatprep.subr.mxu1 %v1347_v8 }
 0x31b   :  { %1327 = vrot.lane.b32.xlu1 %v1315_v9, %s1720_s16  ;;  %1679 = vmatpush3.msra.mxu1 %v1347_v8 }
 0x31d   :  { %1193 = vrot.lane.b32.xlu0 %v1178_v50, %s1717_s3 }
 0x31f   :  { %1249 = vrot.lane.b32.xlu1 %v1234_v51, %s1719_s15 }
 0x321   :  { %1221 = vrot.lane.b32.xlu0 %v1206_v53, %s1718_s29 }
 0x323   :  { %1277 = vrot.lane.b32.xlu1 %v1266_v10, %s1710_s30 }
 0x325   :  { %1275 = vrot.lane.b32.xlu0 %v1261_v25, %s1710_s30 }
 0x327   :  { %1247 = vrot.lane.b32.xlu1 %v1233_v56, %s1719_s15 }
 0x329   :  { %1303 = vrot.lane.b32.xlu0 %v1289_v57, %s1716_s2 }
 0x32b   :  { %1191 = vrot.lane.b32.xlu1 %v1181_v61, %s1717_s3 }
 0x32d   :  { %1273 = vrot.lane.b32.xlu0 %v1264_v63, %s1710_s30 }
 0x32f   :  { %1219 = vrot.lane.b32.xlu1 %v1209_v13, %s1718_s29 }
 0x331   :  { %1301 = vrot.lane.b32.xlu0 %v1292_v55, %s1716_s2 }
 0x333   :  { %1305 = vrot.lane.b32.xlu1 %v1294_v15, %s1716_s2 }
 0x335   :  { %1329 = vrot.lane.b32.xlu0 %v1320_v16, %s1720_s16 }
 0x337   :  { %1333 = vrot.lane.b32.xlu1 %v1322_v44, %s1720_s16  ;;  %v1474_v44 = vld [vmem:[%s2329_s10] sm:$0x1] }
 0x339   :  { %1331 = vrot.lane.b32.xlu0 %v1317_v17, %s1720_s16 }
 0x37d   :  { %v1246_v20 = vpop.permute.xlu1 %1245 }
 0x37f   :  { %v1244_v23 = vpop.permute.xlu0 %1243 }
 0x381   :  { %v1190_v12 = vpop.permute.xlu1 %1189 }
 0x382   :  { %1200 = vst.msk [vmem:[#allocation5 + $0x8] sm:$0xff] %vm699_vm0, %v1190_v12 }
 0x383   :  { %v1272_v24 = vpop.permute.xlu0 %1271 }
 0x385   :  { %v1218_v3 = vpop.permute.xlu1 %1217 }
 0x386   :  { %1228 = vst.msk [vmem:[#allocation5 + $0x8] sm:$0xff] %vm728_vm4, %v1218_v3 }
 0x387   :  { %1256 = vst.msk [vmem:[#allocation5 + $0x8] sm:$0xff] %vm757_vm9, %v1246_v20  ;;  %v1188_v54 = vpop.permute.xlu0 %1187 }
 0x388   :  { %1199 = vst.msk [vmem:[#allocation5] sm:$0xff] %vm699_vm0, %v1188_v54 }
 0x389   :  { %v1300_v19 = vpop.permute.xlu1 %1299 }
 0x38b   :  { %v1216_v26 = vpop.permute.xlu0 %1215 }
 0x38c   :  { %1227 = vst.msk [vmem:[#allocation5] sm:$0xff] %vm728_vm4, %v1216_v26 }
 0x38d   :  { %1255 = vst.msk [vmem:[#allocation5] sm:$0xff] %vm757_vm9, %v1244_v23  ;;  %v1328_v28 = vpop.permute.xlu1 %1327 }
 0x38e   :  { %1283 = vst.msk [vmem:[#allocation5] sm:$0xff] %vm786_vm14, %v1272_v24 }
 0x38f   :  { %1311 = vst.msk [vmem:[#allocation5] sm:$0xff] %vm815_vm12, %v1300_v19  ;;  %v1194_v29 = vpop.permute.xlu0 %1193 }
 0x390   :  { %1339 = vst.msk [vmem:[#allocation5] sm:$0xff] %vm844_vm15, %v1328_v28 }
 0x391   :  { %1202 = vst.msk [vmem:[#allocation5 + $0x18] sm:$0xff] %vm699_vm0, %v1194_v29  ;;  %v1250_v30 = vpop.permute.xlu1 %1249  ;;  %v1475_v29 = vld [vmem:[%s2330_s11] sm:$0x1] }
 0x393   :  { %v1222_v31 = vpop.permute.xlu0 %1221 }
 0x394   :  { %1230 = vst.msk [vmem:[#allocation5 + $0x18] sm:$0xff] %vm728_vm4, %v1222_v31 }
 0x395   :  { %1258 = vst.msk [vmem:[#allocation5 + $0x18] sm:$0xff] %vm757_vm9, %v1250_v30  ;;  %v1278_v32 = vpop.permute.xlu1 %1277 }
 0x396   :  { %1286 = vst.msk [vmem:[#allocation5 + $0x18] sm:$0xff] %vm786_vm14, %v1278_v32 }
 0x397   :  { %v1276_v33 = vpop.permute.xlu0 %1275  ;;  %v1343_v34 = vld [vmem:[#allocation5] sm:$0xff] }
 0x398   :  { %1680 = vmatprep.mubr.msk.f32.mxu1 %vm1351_vm1, %v1343_v34 }
 0x399   :  { %v1248_v35 = vpop.permute.xlu1 %1247 }
 0x39b   :  { %v1304_v36 = vpop.permute.xlu0 %1303 }
 0x39d   :  { %v1192_v37 = vpop.permute.xlu1 %1191 }
 0x39e   :  { %1201 = vst.msk [vmem:[#allocation5 + $0x10] sm:$0xff] %vm699_vm0, %v1192_v37 }
 0x39f   :  { %v1274_v38 = vpop.permute.xlu0 %1273 }
 0x3a0   :  { %1284 = vst.msk [vmem:[#allocation5 + $0x8] sm:$0xff] %vm786_vm14, %v1274_v38 }
 0x3a1   :  { %v1220_v11 = vpop.permute.xlu1 %1219 }
 0x3a2   :  { %1229 = vst.msk [vmem:[#allocation5 + $0x10] sm:$0xff] %vm728_vm4, %v1220_v11 }
 0x3a3   :  { %1257 = vst.msk [vmem:[#allocation5 + $0x10] sm:$0xff] %vm757_vm9, %v1248_v35  ;;  %v1302_v40 = vpop.permute.xlu0 %1301 }
 0x3a4   :  { %1285 = vst.msk [vmem:[#allocation5 + $0x10] sm:$0xff] %vm786_vm14, %v1276_v33  ;;  %vm1488_vm14 = vcmask 122880  }
 0x3a5   :  { %1312 = vst.msk [vmem:[#allocation5 + $0x8] sm:$0xff] %vm815_vm12, %v1302_v40  ;;  %1313 = vst.msk [vmem:[#allocation5 + $0x10] sm:$0xff] %vm815_vm12, %v1304_v36  ;;  %v1306_v41 = vpop.permute.xlu1 %1305 }
 0x3a6   :  { %1314 = vst.msk [vmem:[#allocation5 + $0x18] sm:$0xff] %vm815_vm12, %v1306_v41  ;;  %vm2355_vm12 = vcmask 130048  }
 0x3a7   :  { %v1330_v42 = vpop.permute.xlu0 %1329  ;;  %vm2356_vm0 = vmmov %vm2355_vm12 }
 0x3a8   :  { %1340 = vst.msk [vmem:[#allocation5 + $0x8] sm:$0xff] %vm844_vm15, %v1330_v42  ;;  %vm2357_vm4 = vmmov %vm2356_vm0 }
 0x3a9   :  { %v1334_v43 = vpop.permute.xlu1 %1333  ;;  %vm2358_vm9 = vmmov %vm2356_vm0 }
 0x3aa   :  { %1342 = vst.msk [vmem:[#allocation5 + $0x18] sm:$0xff] %vm844_vm15, %v1334_v43  ;;  %v1504_v43 = vsub.s32 0, %v1818_v5  ;;  %vm2359_vm7 = vmmov %vm2356_vm0 }
 0x3ab   :  { %v1332_v45 = vpop.permute.xlu0 %1331  ;;  %vm2360_vm13 = vmmov %vm2356_vm0 }
 0x3ac   :  { %1341 = vst.msk [vmem:[#allocation5 + $0x10] sm:$0xff] %vm844_vm15, %v1332_v45  ;;  %vm2361_vm10 = vmmov %vm2356_vm0 }
 0x3ad   :  { %vm2362_vm11 = vmmov %vm2356_vm0 }
 0x3af   :  { %v1344_v7 = vld [vmem:[#allocation5 + $0x8] sm:$0xff] }
 0x3b0   :  { %1681 = vmatmul.mubr.msk.f32.vlgmr.msra.gmra.mxu1 %vm1351_vm1, %v1344_v7 }
 0x3b1   :  { %v1346_v47 = vld [vmem:[#allocation5 + $0x18] sm:$0xff] }
 0x3b3   :  { %v1345_v46 = vld [vmem:[#allocation5 + $0x10] sm:$0xff] }
 0x3b4   :  { %1683 = vmatprep.mubr.msk.f32.mxu1 %vm1351_vm1, %v1345_v46 }
 0x3b5   :  { %1684 = vmatmul.mubr.msk.f32.gmra.mxu1 %vm1351_vm1, %v1346_v47 }
 0x470   :  { %v1682_v48 = vpop.f32.mrf.mxu1 }
 0x471   :  { %v1460_v9 = vmul.f32 %v1682_v48, %v1580_v18 }
 0x472   :  { %v1433_v50 = vpop.f32.mrf.mxu1 }
 0x473   :  { %v2280_v51 = vadd.f32 %v1581_v49, %v1460_v9  ;;  %v1459_v52 = vmul.f32 %v1580_v18, %v1433_v50 }
 0x475   :  { %v1470_v53 = vadd.f32 %v1581_v49, %v1459_v52  ;;  %v1685_v10 = vpop.f32.mrf.mxu1  ;;  %v1477_v56 = vsel %vm2355_vm12, %v2280_v51, 0.0 }
 0x476   :  { %v1462_v25 = vmul.f32 %v1685_v10, %v1580_v18 }
 0x477   :  { %v1476_v22 = vsel %vm2356_vm0, %v1470_v53, 0.0  ;;  %v1443_v57 = vpop.f32.mrf.mxu1 }
 0x478   :  { %v1478_v58 = vadd.f32 %v1477_v56, %v1476_v22  ;;  %v2285_v59 = vadd.f32 %v1581_v49, %v1462_v25  ;;  %v1461_v61 = vmul.f32 %v1580_v18, %v1443_v57 }
 0x47a   :  { %v1479_v60 = vrot.slane %v1478_v58, 4  ;;  %v1472_v62 = vadd.f32 %v1581_v49, %v1461_v61  ;;  %v1519_v21 = vsel %vm2357_vm4, %v2285_v59, 0.0 }
 0x47c   :  { %v1480_v63 = vadd.f32 %v1479_v60, %v1478_v58  ;;  %v1518_v0 = vsel %vm2358_vm9, %v1472_v62, 0.0 }
 0x47d   :  { %v1520_v8 = vadd.f32 %v1519_v21, %v1518_v0 }
 0x47e   :  { %v1481_v13 = vrot.slane %v1480_v63, 2 }
 0x47f   :  { %v1521_v27 = vrot.slane %v1520_v8, 4 }
 0x480   :  { %v1482_v55 = vadd.f32 %v1481_v13, %v1480_v63 }
 0x481   :  { %v1522_v14 = vadd.f32 %v1521_v27, %v1520_v8 }
 0x482   :  { %v1483_v15 = vrot.slane %v1482_v55, 1 }
 0x483   :  { %v1523_v39 = vrot.slane %v1522_v14, 2 }
 0x484   :  { %v1484_v16 = vadd.f32 %v1483_v15, %v1482_v55 }
 0x485   :  { %v1524_v17 = vadd.f32 %v1523_v39, %v1522_v14 }
 0x486   :  { %v1486_v20 = vmul.f32 0.0625, %v1484_v16 }
 0x487   :  { %v1525_v23 = vrot.slane %v1524_v17, 1 }
 0x488   :  { %v1487_v12 = vmul.f32 %v1486_v20, %v1474_v44 }
 0x489   :  { %v1526_v24 = vadd.f32 %v1525_v23, %v1524_v17 }
 0x48a   :  { %v1489_v3 = vsel %vm1488_vm14, %v1487_v12, 0.0 }
 0x48b   :  { %1490 = vadd.xlane.f32.xlu0 %v1489_v3  ;;  %v1527_v54 = vmul.f32 0.0625, %v1526_v24 }
 0x48d   :  { %v1528_v19 = vmul.f32 %v1527_v54, %v1474_v44 }
 0x48f   :  { %v1529_v26 = vsel %vm1488_vm14, %v1528_v19, 0.0 }
 0x490   :  { %1530 = vadd.xlane.f32.xlu1 %v1529_v26 }
 0x514   :  { %v1491_v28 = vpop.xlane.xlu0 %1490 }
 0x515   :  { %vm1492_vm15 = vcmp.gt.f32.partialorder %v1491_v28, 0.0  ;;  %v1493_v30 = vmul.f32 0.01, %v1491_v28 }
 0x517   :  { %v1494_v31 = vsel %vm1492_vm15, %v1491_v28, %v1493_v30 }
 0x518   :  { %v1495_v32 = vmul.f32 %v1494_v31, %v1475_v29 }
 0x519   :  { %v1531_v33 = vpop.xlane.xlu1 %1530 }
 0x51a   :  { %v1582_v34 = vmul.f32 -1.442695, %v1495_v32  ;;  %vm1532_vm2 = vcmp.gt.f32.partialorder %v1531_v33, 0.0  ;;  %v1533_v35 = vmul.f32 0.01, %v1531_v33 }
 0x51c   :  { %1701 = vpow2.f32 %v1582_v34  ;;  %v1534_v36 = vsel %vm1532_vm2, %v1531_v33, %v1533_v35 }
 0x51d   :  { %v1535_v37 = vmul.f32 %v1534_v36, %v1475_v29 }
 0x51f   :  { %v1583_v38 = vmul.f32 -1.442695, %v1535_v37 }
 0x521   :  { %1703 = vpow2.f32 %v1583_v38 }
 0x529   :  { %v1702_v11 = vpop.eup %1701 }
 0x52a   :  { %v1499_v40 = vadd.f32 1.0, %v1702_v11 }
 0x52c   :  { %1705 = vrcp.f32 %v1499_v40 }
 0x52e   :  { %v1704_v41 = vpop.eup %1703 }
 0x52f   :  { %v1539_v42 = vadd.f32 1.0, %v1704_v41 }
 0x531   :  { %1707 = vrcp.f32 %v1539_v42 }
 0x539   :  { %v1706_v45 = vpop.eup %1705 }
 0x53a   :  { %v1505_v7 = vrot.slane %v1706_v45, %v1504_v43 }
 0x53c   :  { %v1506_v46 = vmul.f32 %v1505_v7, %v1470_v53  ;;  %v1507_v47 = vmul.f32 %v1505_v7, %v2280_v51 }
 0x53e   :  { %v1708_v18 = vpop.eup %1707  ;;  %v1508_v48 = vadd.f32 %v1506_v46, %v1792_v1  ;;  %v1509_v49 = vadd.f32 %v1507_v47, %v1797_v2 }
 0x53f   :  { %v1545_v9 = vrot.slane %v1708_v18, %v1504_v43 }
 0x540   :  { %vm1510_vm3 = vcmp.gt.f32.partialorder %v1508_v48, 0.0  ;;  %vm1511_vm5 = vcmp.gt.f32.partialorder %v1509_v49, 0.0  ;;  %v1512_v50 = vmul.f32 0.01, %v1508_v48  ;;  %v1513_v52 = vmul.f32 0.01, %v1509_v49 }
 0x541   :  { %v1546_v10 = vmul.f32 %v1545_v9, %v1472_v62  ;;  %v1547_v25 = vmul.f32 %v1545_v9, %v2285_v59 }
 0x542   :  { %v1514_v56 = vsel %vm1510_vm3, %v1508_v48, %v1512_v50  ;;  %v1515_v5 = vsel %vm1511_vm5, %v1509_v49, %v1513_v52 }
 0x543   :  { %1516 = vst.msk [vmem:[%s2331_s12] sm:$0xff] %vm2359_vm7, %v1514_v56  ;;  %v1548_v1 = vadd.f32 %v1546_v10, %v1812_v4  ;;  %v1549_v2 = vadd.f32 %v1547_v25, %v1825_v6 }
 0x544   :  { %1517 = vst.msk [vmem:[%s2331_s12 + $0x8] sm:$0xff] %vm2360_vm13, %v1515_v5 }
 0x545   :  { %vm1550_vm6 = vcmp.gt.f32.partialorder %v1548_v1, 0.0  ;;  %vm1551_vm8 = vcmp.gt.f32.partialorder %v1549_v2, 0.0  ;;  %v1552_v51 = vmul.f32 0.01, %v1548_v1  ;;  %v1553_v53 = vmul.f32 0.01, %v1549_v2 }
 0x547   :  { %v1554_v22 = vsel %vm1550_vm6, %v1548_v1, %v1552_v51  ;;  %v1555_v57 = vsel %vm1551_vm8, %v1549_v2, %v1553_v53 }
 0x548   :  { %1556 = vst.msk [vmem:[%s2331_s12 + $0x10] sm:$0xff] %vm2361_vm10, %v1554_v22 }
 0x549   :  { %1557 = vst.msk [vmem:[%s2331_s12 + $0x18] sm:$0xff] %vm2362_vm11, %v1555_v57 }

</bundles_post_ra>
